<compile_context>
chip_gen: v7x
topology: tpu7x:2x2x1
jax: 0.10.0
libtpu: 0.0.40
codegen_flags: <defaults>
</compile_context>

<pallas_src>
import functools

import jax
import jax.numpy as jnp
from jax.experimental import pallas as pl
from jax.experimental.pallas import tpu as pltpu

EPS = 1e-5


def _bottleneck_ibn_kernel(
    x_ref,        # (1, H, W, Cin)  f32
    w1_ref,       # (Cin, P)        bf16   conv1 1x1
    ibn_g_ref,    # (1, P)  f32  IN gamma in [:half], 0 elsewhere
    ibn_b_ref,    # (1, P)  f32  IN beta  in [:half], 0 elsewhere
    bn1_s_ref,    # (1, P)  f32  folded BN scale in [half:], 1 elsewhere
    bn1_b_ref,    # (1, P)  f32  folded BN shift in [half:], 0 elsewhere
    w2_ref,       # (9*P, P)        bf16   conv2 3x3 taps (bn2 scale folded in)
    bn2_b_ref,    # (1, P)  f32
    w3_ref,       # (P, 4P)         bf16   conv3 1x1 (bn3 scale folded in)
    bn3_b_ref,    # (1, 4P) f32
    o_ref,        # (1, H, W, Cin)  f32   (Cin == 4P, identity residual)
    pad_ref,      # VMEM (H+2, W+2, P) bf16 : zero-padded conv2 input
    col_ref,      # VMEM (H*W, 9*P)    bf16 : im2col matrix
    *,
    half,
):
    _, H, W, Cin = x_ref.shape
    P = w1_ref.shape[1]

    x_flat = x_ref[0].reshape(H * W, Cin)                      # f32

    # ---- conv1 (1x1): bf16 MXU operands, f32 accumulation ------------------
    y = jnp.dot(x_flat.astype(jnp.bfloat16), w1_ref[...],
                preferred_element_type=jnp.float32)            # (HW, P)

    # ---- bn1 = IBN: InstanceNorm on [:half], folded BN on [half:] ----------
    # Per-channel spatial stats are computed for ALL P channels (the BN half is
    # simply discarded by the select) -> no lane-dim slicing / concatenation.
    mean = jnp.mean(y, axis=0, keepdims=True)                  # (1, P)
    var = jnp.mean((y - mean) ** 2, axis=0, keepdims=True)     # biased, like IN
    in_scale = ibn_g_ref[...] * jax.lax.rsqrt(var + EPS)
    in_shift = ibn_b_ref[...] - mean * in_scale
    is_in = jax.lax.broadcasted_iota(jnp.int32, (1, P), 1) < half
    scale = jnp.where(is_in, in_scale, bn1_s_ref[...])
    shift = jnp.where(is_in, in_shift, bn1_b_ref[...])
    y = jnp.maximum(y * scale + shift, 0.0)                    # (HW, P) f32

    # ---- conv2 (3x3, stride 1, pad 1) as a single im2col matmul ------------
    # Zero the whole padded scratch every step (cheap; first-touch-only zeroing
    # would be unsafe if the batch axis is sharded across cores, since scratch
    # is per-core), then write the interior once in bf16.
    pad_ref[...] = jnp.zeros_like(pad_ref)
    pad_ref[pl.ds(1, H), pl.ds(1, W), :] = (
        y.astype(jnp.bfloat16).reshape(H, W, P))

    for dh in range(3):
        band = pad_ref[pl.ds(dh, H)]                           # (H, W+2, P) bf16
        for dw in range(3):
            col_ref[:, pl.ds((dh * 3 + dw) * P, P)] = (
                band[:, dw:dw + W, :].reshape(H * W, P))

    y = jnp.dot(col_ref[...], w2_ref[...],
                preferred_element_type=jnp.float32)            # (HW, P)
    y = jnp.maximum(y + bn2_b_ref[...], 0.0)                   # bn2 scale folded

    # ---- conv3 (1x1) + bn3 shift + residual + relu --------------------------
    y = jnp.dot(y.astype(jnp.bfloat16), w3_ref[...],
                preferred_element_type=jnp.float32)            # (HW, 4P)
    y = jnp.maximum(y + bn3_b_ref[...] + x_flat, 0.0)
    # Real ResNet Cin (>=256) keeps this store lane-dense; the toy Cin=16 config
    # unavoidably uses masked stores.
    o_ref[0] = y.reshape(H, W, Cin).astype(o_ref.dtype)


def _prepare_params(params):
    """Fold BN scales into conv weights, pad IBN vectors to full width, cast
    MXU operands to bf16. Returns (kernel_params, half)."""
    (w1, in_g, in_b, bn1_s, bn1_b, w2, bn2_s, bn2_b, w3, bn3_s, bn3_b) = params
    P = w1.shape[1]
    half = in_g.shape[1]
    f32 = jnp.float32
    bf = jnp.bfloat16

    ibn_g = jnp.concatenate([in_g, jnp.zeros((1, P - half), f32)], axis=1)
    ibn_b = jnp.concatenate([in_b, jnp.zeros((1, P - half), f32)], axis=1)
    bn1_s_full = jnp.concatenate([jnp.ones((1, half), f32), bn1_s], axis=1)
    bn1_b_full = jnp.concatenate([jnp.zeros((1, half), f32), bn1_b], axis=1)

    # Fold inference-mode bn2/bn3 scales into the conv weights (output channels).
    w2_folded = (w2 * bn2_s[0][None, None, :]).reshape(9 * P, P)
    w3_folded = w3 * bn3_s[0][None, :]

    kparams = (w1.astype(bf), ibn_g, ibn_b, bn1_s_full, bn1_b_full,
               w2_folded.astype(bf), bn2_b, w3_folded.astype(bf), bn3_b)
    return kparams, half


def bottleneck_ibn(x, params):
    """x: (N, H, W, Cin) float32, Cin == 4 * planes (stride=1, downsample=None)."""
    N, H, W, Cin = x.shape
    P = params[0].shape[1]
    kparams, half = _prepare_params(params)

    def full_spec(arr):
        nd = arr.ndim
        return pl.BlockSpec(arr.shape, lambda n, _nd=nd: (0,) * _nd)

    in_specs = [pl.BlockSpec((1, H, W, Cin), lambda n: (n, 0, 0, 0))] + [
        full_spec(p) for p in kparams]
    out_specs = pl.BlockSpec((1, H, W, Cin), lambda n: (n, 0, 0, 0))

    flops = 2 * N * H * W * (Cin * P + 9 * P * P + P * 4 * P)
    bytes_accessed = int(
        2 * x.size * x.dtype.itemsize
        + sum(int(p.size) * p.dtype.itemsize for p in kparams))
    cost = pl.CostEstimate(flops=flops, transcendentals=N * P,
                           bytes_accessed=bytes_accessed)

    # NOTE: for large feature maps (e.g. 56x56x256 on v7x's 64 MiB VMEM) a second
    # spatial grid axis with a 1-row halo would be needed; whole-image blocks are
    # fine at these sizes.
    return pl.pallas_call(
        functools.partial(_bottleneck_ibn_kernel, half=half),
        out_shape=jax.ShapeDtypeStruct((N, H, W, Cin), x.dtype),
        grid=(N,),
        in_specs=in_specs,
        out_specs=out_specs,
        scratch_shapes=[
            pltpu.VMEM((H + 2, W + 2, P), jnp.bfloat16),   # padded conv2 input
            pltpu.VMEM((H * W, 9 * P), jnp.bfloat16),      # im2col matrix
        ],
        compiler_params=pltpu.CompilerParams(
            dimension_semantics=("parallel",),
            vmem_limit_bytes=48 * 1024 * 1024,
        ),
        cost_estimate=cost,
    )(x, *kparams)


def make_params(key, inplanes, planes):
    """Deterministic synthetic parameters matching Bottleneck_IBN(__init__)."""
    half = planes // 2
    outp = planes * 4
    ks = jax.random.split(key, 16)
    u = lambda k, s, lo=-0.5, hi=0.5: jax.random.uniform(k, s, jnp.float32, lo, hi)

    # conv weights (already transposed to matmul layout)
    w1 = u(ks[0], (inplanes, planes)) * 0.3                     # 1x1: (Cin, P)
    w2 = u(ks[1], (9, planes, planes)) * 0.3                    # 3x3 taps: (9, P, P)
    w3 = u(ks[2], (planes, outp)) * 0.3                         # 1x1: (P, 4P)

    def fold_bn(kg, kb, km, kv, c):
        gamma = 1.0 + 0.1 * u(kg, (1, c))
        beta = 0.1 * u(kb, (1, c))
        rmean = 0.1 * u(km, (1, c))
        rvar = 0.5 + jnp.abs(u(kv, (1, c)))
        scale = gamma * jax.lax.rsqrt(rvar + EPS)
        shift = beta - rmean * scale
        return scale, shift

    # IBN: InstanceNorm affine params (first half) + folded BN (second half)
    in_g = 1.0 + 0.1 * u(ks[3], (1, half))
    in_b = 0.1 * u(ks[4], (1, half))
    bn1_s, bn1_b = fold_bn(ks[5], ks[6], ks[7], ks[8], planes - half)
    bn2_s, bn2_b = fold_bn(ks[9], ks[10], ks[11], ks[12], planes)
    bn3_s, bn3_b = fold_bn(ks[13], ks[14], ks[15], ks[0], outp)

    return (w1, in_g, in_b, bn1_s, bn1_b, w2, bn2_s, bn2_b, w3, bn3_s, bn3_b)


def reference(x, params):
    """Pure-JAX reference of the same forward pass (NHWC), modelling the kernel's
    bf16-MXU / f32-accumulate precision; norm math and residual in f32."""
    (w1, in_g, in_b, bn1_s, bn1_b, w2, bn2_s, bn2_b, w3, bn3_s, bn3_b) = params
    bf = jnp.bfloat16
    N, H, W, Cin = x.shape
    P = w1.shape[1]
    half = in_g.shape[1]

    y = jnp.einsum("nhwc,cp->nhwp", x.astype(bf), w1.astype(bf),
                   preferred_element_type=jnp.float32)
    y_in = y[..., :half]
    mean = jnp.mean(y_in, axis=(1, 2), keepdims=True)
    var = jnp.mean((y_in - mean) ** 2, axis=(1, 2), keepdims=True)
    y_in = (y_in - mean) * jax.lax.rsqrt(var + EPS) * in_g[0] + in_b[0]
    y_bn = y[..., half:] * bn1_s[0] + bn1_b[0]
    y = jnp.maximum(jnp.concatenate([y_in, y_bn], axis=-1), 0.0)

    yp = jnp.pad(y.astype(bf), ((0, 0), (1, 1), (1, 1), (0, 0)))
    acc = jnp.zeros((N, H, W, P), jnp.float32)
    for dh in range(3):
        for dw in range(3):
            acc = acc + jnp.einsum(
                "nhwc,cp->nhwp", yp[:, dh:dh + H, dw:dw + W, :],
                w2[dh * 3 + dw].astype(bf), preferred_element_type=jnp.float32)
    y = jnp.maximum(acc * bn2_s[0] + bn2_b[0], 0.0)

    y = jnp.einsum("nhwc,cp->nhwp", y.astype(bf), w3.astype(bf),
                   preferred_element_type=jnp.float32) * bn3_s[0] + bn3_b[0]
    return jnp.maximum(y + x, 0.0)


if __name__ == "__main__":
    N, H, W = 2, 8, 8
    planes = 4
    inplanes = planes * 4          # identity residual (downsample=None)

    key = jax.random.PRNGKey(0)
    kx, kp = jax.random.split(key)
    x = jax.random.normal(kx, (N, H, W, inplanes), jnp.float32)
    params = make_params(kp, inplanes, planes)

    out = jax.block_until_ready(bottleneck_ibn(x, params))
    ref = jax.block_until_ready(reference(x, params))

    assert out.shape == (N, H, W, inplanes)
    err = float(jnp.max(jnp.abs(out - ref)))
    assert jnp.allclose(out, ref, atol=2e-2, rtol=2e-2), f"max abs err {err}"
    print("KERNEL_OK")
</pallas_src>

<mosaic_0001>
module attributes {stable_mosaic.version = 11 : i64} {
  func.func @_bottleneck_ibn_kernel(%arg0: i32, %arg1: memref<1x8x8x16xf32, #tpu.memory_space<vmem>>, %arg2: memref<16x4xbf16, #tpu.memory_space<vmem>>, %arg3: memref<1x4xf32, #tpu.memory_space<vmem>>, %arg4: memref<1x4xf32, #tpu.memory_space<vmem>>, %arg5: memref<1x4xf32, #tpu.memory_space<vmem>>, %arg6: memref<1x4xf32, #tpu.memory_space<vmem>>, %arg7: memref<36x4xbf16, #tpu.memory_space<vmem>>, %arg8: memref<1x4xf32, #tpu.memory_space<vmem>>, %arg9: memref<4x16xbf16, #tpu.memory_space<vmem>>, %arg10: memref<1x16xf32, #tpu.memory_space<vmem>>, %arg11: memref<1x8x8x16xf32, #tpu.memory_space<vmem>>, %arg12: memref<10x10x4xbf16, #tpu.memory_space<vmem>>, %arg13: memref<64x36xbf16, #tpu.memory_space<vmem>>) attributes {dimension_semantics = [#tpu.dimension_semantics<parallel>], iteration_bounds = array<i64: 2>, scalar_prefetch = 0 : i64, scratch_operands = 2 : i64, tpu.core_type = #tpu.core_type<tc>, window_params = [{transform_indices = @transform_0, window_bounds = array<i64: 1, 8, 8, 16>}, {pipeline_mode = #tpu.pipeline_mode<synchronous>, transform_indices = @transform_1, window_bounds = array<i64: 16, 4>}, {pipeline_mode = #tpu.pipeline_mode<synchronous>, transform_indices = @transform_2, window_bounds = array<i64: 1, 4>}, {pipeline_mode = #tpu.pipeline_mode<synchronous>, transform_indices = @transform_3, window_bounds = array<i64: 1, 4>}, {pipeline_mode = #tpu.pipeline_mode<synchronous>, transform_indices = @transform_4, window_bounds = array<i64: 1, 4>}, {pipeline_mode = #tpu.pipeline_mode<synchronous>, transform_indices = @transform_5, window_bounds = array<i64: 1, 4>}, {pipeline_mode = #tpu.pipeline_mode<synchronous>, transform_indices = @transform_6, window_bounds = array<i64: 36, 4>}, {pipeline_mode = #tpu.pipeline_mode<synchronous>, transform_indices = @transform_7, window_bounds = array<i64: 1, 4>}, {pipeline_mode = #tpu.pipeline_mode<synchronous>, transform_indices = @transform_8, window_bounds = array<i64: 4, 16>}, {pipeline_mode = #tpu.pipeline_mode<synchronous>, transform_indices = @transform_9, window_bounds = array<i64: 1, 16>}, {transform_indices = @transform_10, window_bounds = array<i64: 1, 8, 8, 16>}]} {
    %c0 = arith.constant 0 : index
    %c0_0 = arith.constant 0 : index
    %c0_1 = arith.constant 0 : index
    %c0_2 = arith.constant 0 : index
    %0 = vector.load %arg1[%c0, %c0_0, %c0_1, %c0_2] : memref<1x8x8x16xf32, #tpu.memory_space<vmem>>, vector<1x8x8x16xf32>
    %1 = vector.shape_cast %0 : vector<1x8x8x16xf32> to vector<8x8x16xf32>
    %2 = vector.shape_cast %1 : vector<8x8x16xf32> to vector<64x16xf32>
    %3 = arith.truncf %2 : vector<64x16xf32> to vector<64x16xbf16>
    %c0_3 = arith.constant 0 : index
    %c0_4 = arith.constant 0 : index
    %4 = vector.load %arg2[%c0_3, %c0_4] : memref<16x4xbf16, #tpu.memory_space<vmem>>, vector<16x4xbf16>
    %cst = arith.constant dense<0.000000e+00> : vector<64x4xf32>
    %5 = tpu.matmul %3, %4, %cst {dimension_numbers = #tpu.dot_dimension_numbers<[1], [0], [0], [1], [0, 0, 1, 1], [], []>} : vector<64x16xbf16>, vector<16x4xbf16>, vector<64x4xf32> -> vector<64x4xf32>
    %cst_5 = arith.constant dense<0.000000e+00> : vector<4xf32>
    %6 = vector.multi_reduction <add>, %5, %cst_5 [0] : vector<64x4xf32> to vector<4xf32>
    %7 = vector.shape_cast %6 : vector<4xf32> to vector<1x4xf32>
    %cst_6 = arith.constant 6.400000e+01 : f32
    %8 = vector.broadcast %cst_6 : f32 to vector<1x4xf32>
    %9 = arith.divf %7, %8 : vector<1x4xf32>
    %10 = vector.broadcast %9 : vector<1x4xf32> to vector<64x4xf32>
    %11 = arith.subf %5, %10 : vector<64x4xf32>
    %12 = arith.mulf %11, %11 : vector<64x4xf32>
    %cst_7 = arith.constant dense<0.000000e+00> : vector<4xf32>
    %13 = vector.multi_reduction <add>, %12, %cst_7 [0] : vector<64x4xf32> to vector<4xf32>
    %14 = vector.shape_cast %13 : vector<4xf32> to vector<1x4xf32>
    %cst_8 = arith.constant 6.400000e+01 : f32
    %15 = vector.broadcast %cst_8 : f32 to vector<1x4xf32>
    %16 = arith.divf %14, %15 : vector<1x4xf32>
    %c0_9 = arith.constant 0 : index
    %c0_10 = arith.constant 0 : index
    %17 = vector.load %arg3[%c0_9, %c0_10] : memref<1x4xf32, #tpu.memory_space<vmem>>, vector<1x4xf32>
    %cst_11 = arith.constant 9.99999974E-6 : f32
    %18 = vector.broadcast %cst_11 : f32 to vector<1x4xf32>
    %19 = arith.addf %16, %18 : vector<1x4xf32>
    %20 = math.rsqrt %19 : vector<1x4xf32>
    %21 = arith.mulf %17, %20 : vector<1x4xf32>
    %c0_12 = arith.constant 0 : index
    %c0_13 = arith.constant 0 : index
    %22 = vector.load %arg4[%c0_12, %c0_13] : memref<1x4xf32, #tpu.memory_space<vmem>>, vector<1x4xf32>
    %23 = arith.mulf %9, %21 : vector<1x4xf32>
    %24 = arith.subf %22, %23 : vector<1x4xf32>
    %25 = tpu.iota {dimensions = array<i32: 1>} : vector<1x4xi32>
    %c2_i32 = arith.constant 2 : i32
    %26 = vector.broadcast %c2_i32 : i32 to vector<1x4xi32>
    %27 = arith.cmpi slt, %25, %26 : vector<1x4xi32>
    %c0_14 = arith.constant 0 : index
    %c0_15 = arith.constant 0 : index
    %28 = vector.load %arg5[%c0_14, %c0_15] : memref<1x4xf32, #tpu.memory_space<vmem>>, vector<1x4xf32>
    %29 = arith.select %27, %21, %28 : vector<1x4xi1>, vector<1x4xf32>
    %c0_16 = arith.constant 0 : index
    %c0_17 = arith.constant 0 : index
    %30 = vector.load %arg6[%c0_16, %c0_17] : memref<1x4xf32, #tpu.memory_space<vmem>>, vector<1x4xf32>
    %31 = arith.select %27, %24, %30 : vector<1x4xi1>, vector<1x4xf32>
    %32 = vector.broadcast %29 : vector<1x4xf32> to vector<64x4xf32>
    %33 = arith.mulf %5, %32 : vector<64x4xf32>
    %34 = vector.broadcast %31 : vector<1x4xf32> to vector<64x4xf32>
    %35 = arith.addf %33, %34 : vector<64x4xf32>
    %cst_18 = arith.constant 0.000000e+00 : f32
    %36 = vector.broadcast %cst_18 : f32 to vector<64x4xf32>
    %37 = arith.maximumf %35, %36 : vector<64x4xf32>
    %cst_19 = arith.constant 0.000000e+00 : bf16
    %38 = vector.broadcast %cst_19 : bf16 to vector<10x10x4xbf16>
    %c0_20 = arith.constant 0 : index
    %c0_21 = arith.constant 0 : index
    %c0_22 = arith.constant 0 : index
    %39 = vector.load %arg12[%c0_20, %c0_21, %c0_22] : memref<10x10x4xbf16, #tpu.memory_space<vmem>>, vector<10x10x4xbf16>
    tpu.vector_store %arg12[%c0_20, %c0_21, %c0_22], %38 {strides = array<i32>} : memref<10x10x4xbf16, #tpu.memory_space<vmem>>, vector<10x10x4xbf16>,
    %40 = arith.truncf %37 : vector<64x4xf32> to vector<64x4xbf16>
    %41 = vector.shape_cast %40 : vector<64x4xbf16> to vector<8x8x4xbf16>
    %c1 = arith.constant 1 : index
    %c1_23 = arith.constant 1 : index
    %c0_24 = arith.constant 0 : index
    %42 = vector.load %arg12[%c1, %c1_23, %c0_24] : memref<10x10x4xbf16, #tpu.memory_space<vmem>>, vector<8x8x4xbf16>
    tpu.vector_store %arg12[%c1, %c1_23, %c0_24], %41 {strides = array<i32>} : memref<10x10x4xbf16, #tpu.memory_space<vmem>>, vector<8x8x4xbf16>,
    %c0_25 = arith.constant 0 : index
    %c0_26 = arith.constant 0 : index
    %c0_27 = arith.constant 0 : index
    %43 = vector.load %arg12[%c0_25, %c0_26, %c0_27] : memref<10x10x4xbf16, #tpu.memory_space<vmem>>, vector<8x10x4xbf16>
    %44 = vector.extract_strided_slice %43 {offsets = [0, 0, 0], sizes = [8, 8, 4], strides = [1, 1, 1]} : vector<8x10x4xbf16> to vector<8x8x4xbf16>
    %45 = vector.shape_cast %44 : vector<8x8x4xbf16> to vector<64x4xbf16>
    %c0_28 = arith.constant 0 : index
    %c0_29 = arith.constant 0 : index
    %46 = vector.load %arg13[%c0_28, %c0_29] : memref<64x36xbf16, #tpu.memory_space<vmem>>, vector<64x4xbf16>
    tpu.vector_store %arg13[%c0_28, %c0_29], %45 {strides = array<i32>} : memref<64x36xbf16, #tpu.memory_space<vmem>>, vector<64x4xbf16>,
    %47 = vector.extract_strided_slice %43 {offsets = [0, 1, 0], sizes = [8, 8, 4], strides = [1, 1, 1]} : vector<8x10x4xbf16> to vector<8x8x4xbf16>
    %48 = vector.shape_cast %47 : vector<8x8x4xbf16> to vector<64x4xbf16>
    %c0_30 = arith.constant 0 : index
    %c4 = arith.constant 4 : index
    %49 = vector.load %arg13[%c0_30, %c4] : memref<64x36xbf16, #tpu.memory_space<vmem>>, vector<64x4xbf16>
    tpu.vector_store %arg13[%c0_30, %c4], %48 {strides = array<i32>} : memref<64x36xbf16, #tpu.memory_space<vmem>>, vector<64x4xbf16>,
    %50 = vector.extract_strided_slice %43 {offsets = [0, 2, 0], sizes = [8, 8, 4], strides = [1, 1, 1]} : vector<8x10x4xbf16> to vector<8x8x4xbf16>
    %51 = vector.shape_cast %50 : vector<8x8x4xbf16> to vector<64x4xbf16>
    %c0_31 = arith.constant 0 : index
    %c8 = arith.constant 8 : index
    %52 = vector.load %arg13[%c0_31, %c8] : memref<64x36xbf16, #tpu.memory_space<vmem>>, vector<64x4xbf16>
    tpu.vector_store %arg13[%c0_31, %c8], %51 {strides = array<i32>} : memref<64x36xbf16, #tpu.memory_space<vmem>>, vector<64x4xbf16>,
    %c1_32 = arith.constant 1 : index
    %c0_33 = arith.constant 0 : index
    %c0_34 = arith.constant 0 : index
    %53 = vector.load %arg12[%c1_32, %c0_33, %c0_34] : memref<10x10x4xbf16, #tpu.memory_space<vmem>>, vector<8x10x4xbf16>
    %54 = vector.extract_strided_slice %53 {offsets = [0, 0, 0], sizes = [8, 8, 4], strides = [1, 1, 1]} : vector<8x10x4xbf16> to vector<8x8x4xbf16>
    %55 = vector.shape_cast %54 : vector<8x8x4xbf16> to vector<64x4xbf16>
    %c0_35 = arith.constant 0 : index
    %c12 = arith.constant 12 : index
    %56 = vector.load %arg13[%c0_35, %c12] : memref<64x36xbf16, #tpu.memory_space<vmem>>, vector<64x4xbf16>
    tpu.vector_store %arg13[%c0_35, %c12], %55 {strides = array<i32>} : memref<64x36xbf16, #tpu.memory_space<vmem>>, vector<64x4xbf16>,
    %57 = vector.extract_strided_slice %53 {offsets = [0, 1, 0], sizes = [8, 8, 4], strides = [1, 1, 1]} : vector<8x10x4xbf16> to vector<8x8x4xbf16>
    %58 = vector.shape_cast %57 : vector<8x8x4xbf16> to vector<64x4xbf16>
    %c0_36 = arith.constant 0 : index
    %c16 = arith.constant 16 : index
    %59 = vector.load %arg13[%c0_36, %c16] : memref<64x36xbf16, #tpu.memory_space<vmem>>, vector<64x4xbf16>
    tpu.vector_store %arg13[%c0_36, %c16], %58 {strides = array<i32>} : memref<64x36xbf16, #tpu.memory_space<vmem>>, vector<64x4xbf16>,
    %60 = vector.extract_strided_slice %53 {offsets = [0, 2, 0], sizes = [8, 8, 4], strides = [1, 1, 1]} : vector<8x10x4xbf16> to vector<8x8x4xbf16>
    %61 = vector.shape_cast %60 : vector<8x8x4xbf16> to vector<64x4xbf16>
    %c0_37 = arith.constant 0 : index
    %c20 = arith.constant 20 : index
    %62 = vector.load %arg13[%c0_37, %c20] : memref<64x36xbf16, #tpu.memory_space<vmem>>, vector<64x4xbf16>
    tpu.vector_store %arg13[%c0_37, %c20], %61 {strides = array<i32>} : memref<64x36xbf16, #tpu.memory_space<vmem>>, vector<64x4xbf16>,
    %c2 = arith.constant 2 : index
    %c0_38 = arith.constant 0 : index
    %c0_39 = arith.constant 0 : index
    %63 = vector.load %arg12[%c2, %c0_38, %c0_39] : memref<10x10x4xbf16, #tpu.memory_space<vmem>>, vector<8x10x4xbf16>
    %64 = vector.extract_strided_slice %63 {offsets = [0, 0, 0], sizes = [8, 8, 4], strides = [1, 1, 1]} : vector<8x10x4xbf16> to vector<8x8x4xbf16>
    %65 = vector.shape_cast %64 : vector<8x8x4xbf16> to vector<64x4xbf16>
    %c0_40 = arith.constant 0 : index
    %c24 = arith.constant 24 : index
    %66 = vector.load %arg13[%c0_40, %c24] : memref<64x36xbf16, #tpu.memory_space<vmem>>, vector<64x4xbf16>
    tpu.vector_store %arg13[%c0_40, %c24], %65 {strides = array<i32>} : memref<64x36xbf16, #tpu.memory_space<vmem>>, vector<64x4xbf16>,
    %67 = vector.extract_strided_slice %63 {offsets = [0, 1, 0], sizes = [8, 8, 4], strides = [1, 1, 1]} : vector<8x10x4xbf16> to vector<8x8x4xbf16>
    %68 = vector.shape_cast %67 : vector<8x8x4xbf16> to vector<64x4xbf16>
    %c0_41 = arith.constant 0 : index
    %c28 = arith.constant 28 : index
    %69 = vector.load %arg13[%c0_41, %c28] : memref<64x36xbf16, #tpu.memory_space<vmem>>, vector<64x4xbf16>
    tpu.vector_store %arg13[%c0_41, %c28], %68 {strides = array<i32>} : memref<64x36xbf16, #tpu.memory_space<vmem>>, vector<64x4xbf16>,
    %70 = vector.extract_strided_slice %63 {offsets = [0, 2, 0], sizes = [8, 8, 4], strides = [1, 1, 1]} : vector<8x10x4xbf16> to vector<8x8x4xbf16>
    %71 = vector.shape_cast %70 : vector<8x8x4xbf16> to vector<64x4xbf16>
    %c0_42 = arith.constant 0 : index
    %c32 = arith.constant 32 : index
    %72 = vector.load %arg13[%c0_42, %c32] : memref<64x36xbf16, #tpu.memory_space<vmem>>, vector<64x4xbf16>
    tpu.vector_store %arg13[%c0_42, %c32], %71 {strides = array<i32>} : memref<64x36xbf16, #tpu.memory_space<vmem>>, vector<64x4xbf16>,
    %c0_43 = arith.constant 0 : index
    %c0_44 = arith.constant 0 : index
    %73 = vector.load %arg13[%c0_43, %c0_44] : memref<64x36xbf16, #tpu.memory_space<vmem>>, vector<64x36xbf16>
    %c0_45 = arith.constant 0 : index
    %c0_46 = arith.constant 0 : index
    %74 = vector.load %arg7[%c0_45, %c0_46] : memref<36x4xbf16, #tpu.memory_space<vmem>>, vector<36x4xbf16>
    %cst_47 = arith.constant dense<0.000000e+00> : vector<64x4xf32>
    %75 = tpu.matmul %73, %74, %cst_47 {dimension_numbers = #tpu.dot_dimension_numbers<[1], [0], [0], [1], [0, 0, 1, 1], [], []>} : vector<64x36xbf16>, vector<36x4xbf16>, vector<64x4xf32> -> vector<64x4xf32>
    %c0_48 = arith.constant 0 : index
    %c0_49 = arith.constant 0 : index
    %76 = vector.load %arg8[%c0_48, %c0_49] : memref<1x4xf32, #tpu.memory_space<vmem>>, vector<1x4xf32>
    %77 = vector.broadcast %76 : vector<1x4xf32> to vector<64x4xf32>
    %78 = arith.addf %75, %77 : vector<64x4xf32>
    %cst_50 = arith.constant 0.000000e+00 : f32
    %79 = vector.broadcast %cst_50 : f32 to vector<64x4xf32>
    %80 = arith.maximumf %78, %79 : vector<64x4xf32>
    %81 = arith.truncf %80 : vector<64x4xf32> to vector<64x4xbf16>
    %c0_51 = arith.constant 0 : index
    %c0_52 = arith.constant 0 : index
    %82 = vector.load %arg9[%c0_51, %c0_52] : memref<4x16xbf16, #tpu.memory_space<vmem>>, vector<4x16xbf16>
    %cst_53 = arith.constant dense<0.000000e+00> : vector<64x16xf32>
    %83 = tpu.matmul %81, %82, %cst_53 {dimension_numbers = #tpu.dot_dimension_numbers<[1], [0], [0], [1], [0, 0, 1, 1], [], []>} : vector<64x4xbf16>, vector<4x16xbf16>, vector<64x16xf32> -> vector<64x16xf32>
    %c0_54 = arith.constant 0 : index
    %c0_55 = arith.constant 0 : index
    %84 = vector.load %arg10[%c0_54, %c0_55] : memref<1x16xf32, #tpu.memory_space<vmem>>, vector<1x16xf32>
    %85 = vector.broadcast %84 : vector<1x16xf32> to vector<64x16xf32>
    %86 = arith.addf %83, %85 : vector<64x16xf32>
    %87 = arith.addf %86, %2 : vector<64x16xf32>
    %cst_56 = arith.constant 0.000000e+00 : f32
    %88 = vector.broadcast %cst_56 : f32 to vector<64x16xf32>
    %89 = arith.maximumf %87, %88 : vector<64x16xf32>
    %90 = vector.shape_cast %89 : vector<64x16xf32> to vector<8x8x16xf32>
    %c0_57 = arith.constant 0 : index
    %c0_58 = arith.constant 0 : index
    %c0_59 = arith.constant 0 : index
    %c0_60 = arith.constant 0 : index
    %91 = vector.load %arg11[%c0_57, %c0_58, %c0_59, %c0_60] : memref<1x8x8x16xf32, #tpu.memory_space<vmem>>, vector<1x8x8x16xf32>
    %92 = vector.shape_cast %91 : vector<1x8x8x16xf32> to vector<8x8x16xf32>
    %93 = vector.shape_cast %90 : vector<8x8x16xf32> to vector<1x8x8x16xf32>
    tpu.vector_store %arg11[%c0_57, %c0_58, %c0_59, %c0_60], %93 {strides = array<i32>} : memref<1x8x8x16xf32, #tpu.memory_space<vmem>>, vector<1x8x8x16xf32>,
    return
  }
  func.func @transform_0(%arg0: i32) -> (i32, i32, i32, i32) {
    %c0_i32 = arith.constant 0 : i32
    %c0_i32_0 = arith.constant 0 : i32
    %c0_i32_1 = arith.constant 0 : i32
    %c0_i32_2 = arith.constant 0 : i32
    return %arg0, %c0_i32, %c0_i32_0, %c0_i32_1 : i32, i32, i32, i32
  }
  func.func @transform_1(%arg0: i32) -> (i32, i32) {
    %c0_i32 = arith.constant 0 : i32
    %c0_i32_0 = arith.constant 0 : i32
    %c0_i32_1 = arith.constant 0 : i32
    return %c0_i32, %c0_i32_0 : i32, i32
  }
  func.func @transform_2(%arg0: i32) -> (i32, i32) {
    %c0_i32 = arith.constant 0 : i32
    %c0_i32_0 = arith.constant 0 : i32
    %c0_i32_1 = arith.constant 0 : i32
    return %c0_i32, %c0_i32_0 : i32, i32
  }
  func.func @transform_3(%arg0: i32) -> (i32, i32) {
    %c0_i32 = arith.constant 0 : i32
    %c0_i32_0 = arith.constant 0 : i32
    %c0_i32_1 = arith.constant 0 : i32
    return %c0_i32, %c0_i32_0 : i32, i32
  }
  func.func @transform_4(%arg0: i32) -> (i32, i32) {
    %c0_i32 = arith.constant 0 : i32
    %c0_i32_0 = arith.constant 0 : i32
    %c0_i32_1 = arith.constant 0 : i32
    return %c0_i32, %c0_i32_0 : i32, i32
  }
  func.func @transform_5(%arg0: i32) -> (i32, i32) {
    %c0_i32 = arith.constant 0 : i32
    %c0_i32_0 = arith.constant 0 : i32
    %c0_i32_1 = arith.constant 0 : i32
    return %c0_i32, %c0_i32_0 : i32, i32
  }
  func.func @transform_6(%arg0: i32) -> (i32, i32) {
    %c0_i32 = arith.constant 0 : i32
    %c0_i32_0 = arith.constant 0 : i32
    %c0_i32_1 = arith.constant 0 : i32
    return %c0_i32, %c0_i32_0 : i32, i32
  }
  func.func @transform_7(%arg0: i32) -> (i32, i32) {
    %c0_i32 = arith.constant 0 : i32
    %c0_i32_0 = arith.constant 0 : i32
    %c0_i32_1 = arith.constant 0 : i32
    return %c0_i32, %c0_i32_0 : i32, i32
  }
  func.func @transform_8(%arg0: i32) -> (i32, i32) {
    %c0_i32 = arith.constant 0 : i32
    %c0_i32_0 = arith.constant 0 : i32
    %c0_i32_1 = arith.constant 0 : i32
    return %c0_i32, %c0_i32_0 : i32, i32
  }
  func.func @transform_9(%arg0: i32) -> (i32, i32) {
    %c0_i32 = arith.constant 0 : i32
    %c0_i32_0 = arith.constant 0 : i32
    %c0_i32_1 = arith.constant 0 : i32
    return %c0_i32, %c0_i32_0 : i32, i32
  }
  func.func @transform_10(%arg0: i32) -> (i32, i32, i32, i32) {
    %c0_i32 = arith.constant 0 : i32
    %c0_i32_0 = arith.constant 0 : i32
    %c0_i32_1 = arith.constant 0 : i32
    %c0_i32_2 = arith.constant 0 : i32
    return %arg0, %c0_i32, %c0_i32_0, %c0_i32_1 : i32, i32, i32, i32
  }
}

</mosaic_0001>

<bundles_post_ra>
// kernel: tpu_custom_call.1
= control target key start
LH: loop header
LB: loop body
LE: loop exit
PB: predicated region body
PF: predicated region fallthrough
CT: control target
= control target key end

     0   :  { %15 = vsyncpa [#allocation5], 0  ;;  %s3193_s0 = inlined_call_operand.hbm [shape: f32[2,8,8,16], index: 0, kind: input, shape index: {}]   ;;  %s3194_s1 = inlined_call_operand.vmem [shape: bf16[16,4], index: 1, kind: input, shape index: {}]   ;;  %s3195_s2 = inlined_call_operand.vmem [shape: f32[1,4], index: 2, kind: input, shape index: {}]   ;;  %s3196_s3 = inlined_call_operand.vmem [shape: f32[1,4], index: 3, kind: input, shape index: {}]   ;;  %s3197_s4 = inlined_call_operand.vmem [shape: f32[1,4], index: 4, kind: input, shape index: {}]   ;;  %s3198_s5 = inlined_call_operand.vmem [shape: f32[1,4], index: 5, kind: input, shape index: {}]   ;;  %s3199_s6 = inlined_call_operand.vmem [shape: bf16[36,4], index: 6, kind: input, shape index: {}]   ;;  %s3200_s7 = inlined_call_operand.vmem [shape: f32[1,4], index: 7, kind: input, shape index: {}]   ;;  %s3201_s8 = inlined_call_operand.vmem [shape: bf16[4,16], index: 8, kind: input, shape index: {}]   ;;  %s3202_s9 = inlined_call_operand.vmem [shape: f32[1,16], index: 9, kind: input, shape index: {}]   ;;  %s3203_s10 = inlined_call_operand.hbm [shape: f32[2,8,8,16], index: 10, kind: output, shape index: {}]  }
   0x1   :  { %17 = vsyncpa [#allocation5 + $0x1], 0 }
   0x2   :  { %18 = vsyncpa [#allocation6], 0 }
   0x3   :  { %20 = vsyncpa [#allocation6 + $0x1], 0  ;;  %s2290_s13 = smov 0   ;;  %s2292_s14 = smov 0  }
   0x4   :  { %s2294_s15 = smov 0   ;;  %s2296_s16 = smov 0  }
   0x5 LB: > { %s2311_s17 = sadd.s32 4294967295, %s2219_s16   ;;  %s1877_s18 = sadd.s32 4294967294, %s2219_s16   ;;  %s2219_s16 = sphi %s2296_s16, %s3283_s16   ;;  %s2215_s15 = sphi %s2294_s15, %s3282_s15   ;;  %s2211_s14 = sphi %s2292_s14, %s3281_s14   ;;  %s2207_s13 = sphi %s2290_s13, %s3280_s13  }
   0x6   : > { %s2315_s19 = sadd.s32 1, %s2219_s16   ;;  %s33_s20 = sadd.s32 1, %s2215_s15 }
   0x7   : > { %s30_s21 = ssub.s32 %s2219_s16, %s2315_s19  ;;  %p40_p0 = scmp.ne.s32.totalorder %s2215_s15, %s2211_s14 }
   0x8   : > { %p31_p1 = scmp.eq.s32.totalorder %s30_s21, 0  ;;  %p41_p2 = scmp.eq.s32.totalorder %s2219_s16, 0 }
   0x9   : > { %p46_p3 = scmp.ne.s32.totalorder %s2211_s14, %s2207_s13  ;;  %p47_p4 = scmp.eq.s32.totalorder %s2311_s17, 0 }
   0xa   : > { %s2327_s22 = scalar_select %p31_p1, %s2215_s15, %s33_s20  }
   0xb   : > { %p2329_p5 = por %p41_p2, %p40_p0  ;;  %p2333_p6 = por %p47_p4, %p46_p3 }
   0xc   : > { %3216 = sst [smem:[#allocation10_spill]] %s2327_s22  ;;  %p259_p7 = scmp.eq.s32.totalorder %s2311_s17, 1 }
   0xd   : > { %p265_p8 = scmp.eq.s32.totalorder %s1877_s18, 1  ;;  %p2054_p10 = scmp.lt.s32.totalorder %s2219_s16, 2 }
   0xe   : > { %p2340_p11 = por %p259_p7, %p40_p0  ;;  %s312_s27 = sand.u32 1, %s2215_s15  }
   0xf   : > { %p2344_p12 = por %p265_p8, %p46_p3  ;;  %s1977_s28 = sshll.u32 %s2219_s16, 10 }
  0x10   : > { %s3219_s25 = scalar_select %p2340_p11, 1, 0 }
  0x11   : > { %s3220_s26 = scalar_select %p2344_p12, 1, 0 }
  0x12   : > { %s1880_s29 = sshll.u32 %s312_s27, 6  ;;  %s2353_s12 = scalar_lea.hbm %s3193_s0, %s1977_s28 }
  0x13   : > { %s316_s18 = scalar_lea.vmem [#allocation4], %s1880_s29  ;;  %p2357_p13 = pnand %p2054_p10, %p2329_p5 }
  0x14   : > { %s323_s20 = sshll.u32 %s316_s18, 4  ;;  %s2363_s22 = scalar_lea.sflag [#allocation5], %s312_s27  ;;  %s2361_s20 = int_to_ptr.vmem [resolvable:$true] %s323_s20 }
  0x15   : > { %s2123_s30 = scalar_lea.hbm %s2353_s12, 1024  ;;  %p2125_p1 = pneg %p2357_p13 }
  0x16   : > { %p2124_p0 = scmp.ne.s32.totalorder %s2353_s12, %s2123_s30  ;;  %s2128_s29 = scalar_lea.hbm %s3193_s0, 2048 }
  0x17   : > { %p2129_p4 = scmp.lt.u32.totalorder %s2353_s12, %s3193_s0  ;;  %p2130_p5 = scmp.lt.u32.totalorder %s2128_s29, %s2123_s30 }
  0x18   : > { %p2126_p2 = pnand %p2125_p1, %p2124_p0  ;;  %p2132_p8 = scmp.lt.u32.totalorder %s2123_s30, %s2353_s12 }
  0x19   : > { %p2131_p7 = por %p2130_p5, %p2129_p4 }
  0x1a   : > { %p2127_p3 = pneg %p2126_p2 }
  0x1b   : > { %p2133_p10 = por %p2132_p8, %p2131_p7 }
  0x1d   : > { %p2134_p9 = pnand %p2133_p10, %p2127_p3 }
  0x1f   : > { %2137 = shalt.err (!%p2134_p9)
}
  0x20   : > { %s2138_s27 = scalar_lea.vmem %s2361_s20, 1024  ;;  %s2221_s28 = smov [#allocation4]  }
  0x21   : > { %p2139_p0 = scmp.ne.s32.totalorder %s2361_s20, %s2138_s27  ;;  %s2143_s23 = sshll.u32 %s2221_s28, 4  ;;  %s2144_s23 = int_to_ptr.vmem [resolvable:$false] %s2143_s23 }
  0x22   : > { %s2145_s11 = scalar_lea.vmem %s2144_s23, 2048  ;;  %p2146_p11 = scmp.lt.s32.totalorder %s2361_s20, %s2144_s23 }
  0x23   : > { %p2141_p2 = pnand %p2139_p0, %p2125_p1  ;;  %p2147_p4 = scmp.lt.s32.totalorder %s2145_s11, %s2138_s27 }
  0x25   : > { %p2142_p12 = pneg %p2141_p2  ;;  %p2148_p5 = por %p2147_p4, %p2146_p11 }
  0x27   : > { %p2149_p7 = pnand %p2148_p5, %p2142_p12 }
  0x29   : > { %2152 = shalt.err (!%p2149_p7)
}
  0x2a   : > { %s2222_s30 = smov 128   ;;  %s2223_s29 = smov 8  }
  0x2b   : > { %2049 = dma.hbm_to_vmem [thread:$0]  (!%p2357_p13), %s2353_s12, 1024, %s2361_s20, %s2363_s22, %s2222_s30, %s2222_s30, %s2223_s29  }
  0x2c   : > { %p1883_p9 = scmp.ge.s32.totalorder %s2219_s16, 1  ;;  %p331_p1 = scmp.lt.s32.totalorder %s2219_s16, 3 }
  0x2e   : > { %p332_p3 = pnand %p1883_p9, %p331_p1 }
  0x30   : > { %335 = sbr.rel (%p332_p3) target bundleno = 1053 (0x41d), region = 60 }
  0x37   : > { %s2394_s18 = sand.u32 1, %s2211_s14  }
  0x38   : > { %s1884_s27 = sshll.u32 %s2394_s18, 6  ;;  %s338_s28 = scalar_lea.sflag [#allocation5], %s2394_s18 }
  0x39   : > { %s2400_s23 = scalar_lea.vmem [#allocation4], %s1884_s27 }
  0x3a   : > { %2198 = dma.done.wait (%p2333_p6), %s338_s28, 1024  }
  0x3b   : > { %2200 = vsyncadd (%p2333_p6), %s338_s28, 4294966272  ;;  %v2100_v0 = vld [vmem:[%s3194_s1] sm:$0xff]   ;;  %v379_v1 = vld [vmem:[%s2400_s23] sm:$0xff]  ;;  %vm399_vm0 = vcmask 130048   ;;  %vm585_vm1 = vcmask 27648   ;;  %vm587_vm2 = vcmask 24576  }
  0x3c   : > { %v380_v2 = vld [vmem:[%s2400_s23 + $0x8] sm:$0xff]  ;;  %v381_v3 = vld [vmem:[%s2400_s23 + $0x10] sm:$0xff]  ;;  %2004 = vmatprep.subr.bf16.mxu0 %v2100_v0  ;;  %v382_v5 = vld [vmem:[%s2400_s23 + $0x18] sm:$0xff]  ;;  %2038 = vmatprep.subr.bf16.mxu1 %v2100_v0  ;;  %v2224_v13 = vmov 0   ;;  %vm477_vm3 = vcmask 31744   ;;  %vm962_vm7 = vcmask 1042432  }
  0x3d   : > { %v387_v4 = vpack.c.bf16 %v380_v2, %v379_v1  ;;  %v383_v6 = vld [vmem:[%s2400_s23 + $0x20] sm:$0xff]  ;;  %v384_v7 = vld [vmem:[%s2400_s23 + $0x28] sm:$0xff]  ;;  %2005 = vmatpush3.bf16.msra.mxu0 %v2100_v0  ;;  %v388_v8 = vpack.c.bf16 %v382_v5, %v381_v3  ;;  %2039 = vmatpush3.bf16.msra.mxu1 %v2100_v0  ;;  %v385_v10 = vld [vmem:[%s2400_s23 + $0x30] sm:$0xff]  ;;  %599 = vst.msk [vmem:[#allocation2 + $0x30] sm:$0xf] %vm585_vm1, %v2224_v13  ;;  %vm963_vm8 = vcmask 1046532  }
  0x3e   : > { %v389_v9 = vpack.c.bf16 %v384_v7, %v383_v6  ;;  %v386_v11 = vld [vmem:[%s2400_s23 + $0x38] sm:$0xff]  ;;  %600 = vst.msk [vmem:[#allocation2 + $0x34] sm:$0x1] %vm587_vm2, %v2224_v13  ;;  %588 = vst.msk [vmem:[#allocation2 + $0x4] sm:$0x1] %vm587_vm2, %v2224_v13  ;;  %s2225_s12 = smov 12  }
  0x3f   : > { %2006 = vmatprep.mubr.msk.bf16.mxu0 %vm399_vm0, %v387_v4  ;;  %v390_v12 = vpack.c.bf16 %v386_v11, %v385_v10  ;;  %586 = vst.msk [vmem:[#allocation2] sm:$0xf] %vm585_vm1, %v2224_v13  ;;  %589 = vst.msk [vmem:[#allocation2 + $0x8] sm:$0xf] %vm585_vm1, %v2224_v13  ;;  %vm713_vm5 = vsmask.f32 7938 }
  0x40   : > { %2010 = vmatprep.mubr.msk.bf16.mxu1 %vm399_vm0, %v389_v9  ;;  %2007 = vmatmul.mubr.msk.bf16.vlgmr.msra.gmra.mrb[0].mxu0 %vm399_vm0, %v388_v8  ;;  %590 = vst.msk [vmem:[#allocation2 + $0xc] sm:$0x1] %vm587_vm2, %v2224_v13  ;;  %592 = vst.msk [vmem:[#allocation2 + $0x14] sm:$0x1] %vm587_vm2, %v2224_v13  ;;  %vm719_vm6 = vsmask.f32 256 }
  0x41   : > { %2011 = vmatmul.mubr.msk.bf16.vlgmr.msra.gmra.mrb[0].mxu1 %vm399_vm0, %v390_v12  ;;  %591 = vst.msk [vmem:[#allocation2 + $0x10] sm:$0xf] %vm585_vm1, %v2224_v13  ;;  %593 = vst.msk [vmem:[#allocation2 + $0x18] sm:$0xf] %vm585_vm1, %v2224_v13  ;;  %vm810_vm9 = vsmask.f32 3328 }
  0x42   : > { %594 = vst.msk [vmem:[#allocation2 + $0x1c] sm:$0x1] %vm587_vm2, %v2224_v13  ;;  %596 = vst.msk [vmem:[#allocation2 + $0x24] sm:$0x1] %vm587_vm2, %v2224_v13  ;;  %vm811_vm10 = vsmask.f32 7440 }
  0x43   : > { %595 = vst.msk [vmem:[#allocation2 + $0x20] sm:$0xf] %vm585_vm1, %v2224_v13  ;;  %597 = vst.msk [vmem:[#allocation2 + $0x28] sm:$0xf] %vm585_vm1, %v2224_v13  ;;  %s2226_s24 = smov 24   ;;  %s2227_s20 = smov 8  }
  0x44   : > { %598 = vst.msk [vmem:[#allocation2 + $0x2c] sm:$0x1] %vm587_vm2, %v2224_v13  ;;  %602 = vst.msk [vmem:[#allocation2 + $0x3c] sm:$0x1] %vm587_vm2, %v2224_v13  ;;  %s2228_s21 = smov 20   ;;  %s2229_s11 = smov 32  }
  0x45   : > { %601 = vst.msk [vmem:[#allocation2 + $0x38] sm:$0xf] %vm585_vm1, %v2224_v13  ;;  %603 = vst.msk [vmem:[#allocation2 + $0x40] sm:$0xf] %vm585_vm1, %v2224_v13  ;;  %s2230_s30 = smov 16   ;;  %s2231_s29 = smov 4  }
  0x46   : > { %604 = vst.msk [vmem:[#allocation2 + $0x44] sm:$0x1] %vm587_vm2, %v2224_v13  ;;  %606 = vst.msk [vmem:[#allocation2 + $0x4c] sm:$0x1] %vm587_vm2, %v2224_v13  ;;  %s2232_s28 = smov 28   ;;  %vm1597_vm15 = vcmask 1041408  }
  0x47   : > { %605 = vst.msk [vmem:[#allocation2 + $0x48] sm:$0xf] %vm585_vm1, %v2224_v13  ;;  %vm2541_vm11 = vmand %vm585_vm1, %vm713_vm5  ;;  %vm949_vm1 = vcmask 64544   ;;  %vm1215_vm5 = vcmask 162944   ;;  %p3276_p11 = scmp.ne.s32.totalorder %s3219_s25, 0 }
  0x48   : > { %vm2547_vm12 = vmand %vm587_vm2, %vm719_vm6  ;;  %vm1021_vm2 = vcmask 97344   ;;  %vm1284_vm6 = vcmask 195744  }
  0x49   : > { %vm2573_vm13 = vmor %vm962_vm7, %vm963_vm8  ;;  %vm1338_vm7 = vcmask 228544   ;;  %vm1479_vm8 = vcmask 261344  }
  0x4a   : > { %vm2585_vm14 = vmor %vm810_vm9, %vm811_vm10  ;;  %vm1548_vm9 = vcmask 294144   ;;  %vm1584_vm10 = vcmask 293888  }
 0x113   : > { %v2441_v14 = vpop.f32.mrb[0].mxu0 }
 0x114   : > { %v2443_v15 = vpop.f32.mrb[0].mxu1  ;;  %v2445_v16 = vpop.f32.mrb[1].mxu0  ;;  %v481_v25 = vsel %vm477_vm3, %v2441_v14, 0.0 }
 0x115   : > { %v2447_v17 = vpop.f32.mrb[1].mxu1  ;;  %v2449_v18 = vpop.f32.mrb[2].mxu0  ;;  %v478_v22 = vsel %vm477_vm3, %v2445_v16, 0.0  ;;  %v489_v33 = vsel %vm477_vm3, %v2443_v15, 0.0 }
 0x116   : > { %v2451_v19 = vpop.f32.mrb[2].mxu1  ;;  %v2453_v20 = vpop.f32.mrb[3].mxu0  ;;  %v483_v27 = vsel %vm477_vm3, %v2449_v18, 0.0  ;;  %v485_v28 = vsel %vm477_vm3, %v2447_v17, 0.0 }
 0x117   : > { %v2455_v21 = vpop.f32.mrb[3].mxu1  ;;  %v479_v23 = vsel %vm477_vm3, %v2453_v20, 0.0  ;;  %v491_v35 = vsel %vm477_vm3, %v2451_v19, 0.0 }
 0x118   : > { %v480_v24 = vadd.f32 %v479_v23, %v478_v22  ;;  %v487_v31 = vsel %vm477_vm3, %v2455_v21, 0.0 }
 0x11a   : > { %v482_v26 = vadd.f32 %v481_v25, %v480_v24 }
 0x11c   : > { %v484_v29 = vadd.f32 %v483_v27, %v482_v26  ;;  %v546_v27 = vlaneseq }
 0x11e   : > { %v486_v30 = vadd.f32 %v485_v28, %v484_v29  ;;  %v2489_v28 = vld [vmem:[#allocation2] sm:$0xf]  ;;  %v2491_v29 = vld [vmem:[#allocation2 + $0x48] sm:$0xf] }
 0x11f   : > { %3222 = vst [vmem:[#allocation11_spill] sm:$0xff] %v2491_v29 }
 0x120   : > { %v488_v32 = vadd.f32 %v487_v31, %v486_v30  ;;  %v547_v30 = vand.u32 127, %v546_v27  ;;  %v554_v31 = vshrl.u32 %v546_v27, 7 }
 0x122   : > { %v490_v34 = vadd.f32 %v489_v33, %v488_v32  ;;  %v814_v32 = vshrl.u32 %v2489_v28, 16  ;;  %v817_v33 = vshll.u32 %v2489_v28, 16  ;;  %vm548_vm4 = vcmp.lt.s32.totalorder %v547_v30, 2 }
 0x124   : > { %v492_v36 = vadd.f32 %v491_v35, %v490_v34  ;;  %v1442_v34 = vshrl.u32 %v2491_v29, 16  ;;  %v1445_v35 = vshll.u32 %v2491_v29, 16 }
 0x126   : > { %v493_v37 = vrot.slane %v492_v36, 4 }
 0x128   : > { %v494_v38 = vadd.f32 %v493_v37, %v492_v36  ;;  %v539_v36 = vld [vmem:[%s3195_s2] sm:$0x1] }
 0x12a   : > { %v495_v39 = vrot.slane %v494_v38, 2 }
 0x12c   : > { %v496_v40 = vadd.f32 %v495_v39, %v494_v38  ;;  %v549_v38 = vld [vmem:[%s3197_s4] sm:$0x1]  ;;  %v555_v39 = vsub.s32 0, %v554_v31 }
 0x12e   : > { %v497_v41 = vrot.slane %v496_v40, 1 }
 0x130   : > { %v498_v42 = vadd.f32 %v497_v41, %v496_v40  ;;  %v816_v40 = vrot.slane %v814_v32, 4  ;;  %v819_v41 = vrot.slane %v817_v33, 5 }
 0x132   : > { %v500_v43 = vmul.f32 0.015625, %v498_v42 }
 0x134   : > { %v501_v44 = vsub.f32 %v2445_v16, %v500_v43  ;;  %v502_v45 = vsub.f32 %v2453_v20, %v500_v43  ;;  %v503_v46 = vsub.f32 %v2441_v14, %v500_v43  ;;  %v504_v47 = vsub.f32 %v2449_v18, %v500_v43 }
 0x135   : > { %v505_v48 = vsub.f32 %v2447_v17, %v500_v43  ;;  %v506_v49 = vsub.f32 %v2455_v21, %v500_v43  ;;  %v507_v50 = vsub.f32 %v2443_v15, %v500_v43  ;;  %v508_v51 = vsub.f32 %v2451_v19, %v500_v43 }
 0x136   : > { %v509_v52 = vmul.f32 %v501_v44, %v501_v44  ;;  %v510_v53 = vmul.f32 %v502_v45, %v502_v45  ;;  %v511_v54 = vmul.f32 %v503_v46, %v503_v46  ;;  %v512_v55 = vmul.f32 %v504_v47, %v504_v47  ;;  %v543_v46 = vld [vmem:[%s3196_s3] sm:$0x1] }
 0x137   : > { %v513_v59 = vmul.f32 %v505_v48, %v505_v48  ;;  %v514_v62 = vmul.f32 %v506_v49, %v506_v49  ;;  %v515_v1 = vmul.f32 %v507_v50, %v507_v50  ;;  %v516_v4 = vmul.f32 %v508_v51, %v508_v51  ;;  %v551_v49 = vld [vmem:[%s3198_s5] sm:$0x1]  ;;  %v2510_v51 = vld [vmem:[#allocation2 + $0x4] sm:$0x1] }
 0x138   : > { %v517_v56 = vsel %vm477_vm3, %v509_v52, 0.0  ;;  %v518_v57 = vsel %vm477_vm3, %v510_v53, 0.0  ;;  %v520_v60 = vsel %vm477_vm3, %v511_v54, 0.0  ;;  %v522_v63 = vsel %vm477_vm3, %v512_v55, 0.0  ;;  %v2512_v53 = vld [vmem:[#allocation2 + $0x4c] sm:$0x1] }
 0x139   : > { %v519_v58 = vadd.f32 %v518_v57, %v517_v56  ;;  %v524_v2 = vsel %vm477_vm3, %v513_v59, 0.0  ;;  %v526_v5 = vsel %vm477_vm3, %v514_v62, 0.0  ;;  %v528_v7 = vsel %vm477_vm3, %v515_v1, 0.0  ;;  %3223 = vst [vmem:[#allocation12_spill] sm:$0xff] %v2512_v53 }
 0x13a   : > { %v530_v9 = vsel %vm477_vm3, %v516_v4, 0.0  ;;  %v1444_v44 = vrot.slane %v1442_v34, 4  ;;  %v1447_v45 = vrot.slane %v1445_v35, 5  ;;  %v820_v52 = vor.u32 %v819_v41, %v816_v40 }
 0x13b   : > { %v521_v61 = vadd.f32 %v520_v60, %v519_v58  ;;  %v823_v55 = vshll.u32 %v2510_v51, 16  ;;  %v1451_v57 = vshll.u32 %v2512_v53, 16 }
 0x13c   : > { %v1448_v56 = vor.u32 %v1447_v45, %v1444_v44 }
 0x13d   : > { %v523_v0 = vadd.f32 %v522_v63, %v521_v61  ;;  %v2533_v4 = vrot.slane %v1451_v57, 5 }
 0x13f   : > { %v525_v3 = vadd.f32 %v524_v2, %v523_v0  ;;  %3225 = vst [vmem:[#allocation14_spill] sm:$0xff] %v2533_v4 }
 0x141   : > { %v527_v6 = vadd.f32 %v526_v5, %v525_v3  ;;  %v2531_v3 = vrot.slane %v1448_v56, 4 }
 0x143   : > { %v529_v8 = vadd.f32 %v528_v7, %v527_v6  ;;  %3224 = vst [vmem:[#allocation13_spill] sm:$0xff] %v2531_v3 }
 0x145   : > { %v531_v10 = vadd.f32 %v530_v9, %v529_v8 }
 0x147   : > { %v532_v11 = vrot.slane %v531_v10, 4 }
 0x149   : > { %v533_v12 = vadd.f32 %v532_v11, %v531_v10 }
 0x14b   : > { %v534_v13 = vrot.slane %v533_v12, 2 }
 0x14d   : > { %v535_v22 = vadd.f32 %v534_v13, %v533_v12 }
 0x14f   : > { %v536_v23 = vrot.slane %v535_v22, 1 }
 0x151   : > { %v537_v24 = vadd.f32 %v536_v23, %v535_v22 }
 0x153   : > { %v538_v25 = vmul.f32 0.015625, %v537_v24 }
 0x155   : > { %v540_v26 = vadd.f32 1e-05, %v538_v25 }
 0x157   : > { %2113 = vrsqrt.f32 %v540_v26 }
 0x161   : > { %v2114_v37 = vpop.eup %2113 }
 0x162   : > { %v542_v42 = vmul.f32 %v2114_v37, %v539_v36 }
 0x164   : > { %v544_v47 = vmul.f32 %v542_v42, %v500_v43  ;;  %v550_v48 = vsel %vm548_vm4, %v542_v42, %v549_v38 }
 0x165   : > { %v556_v50 = vrot.slane %v550_v48, %v555_v39 }
 0x166   : > { %v545_v54 = vsub.f32 %v543_v46, %v544_v47  ;;  %v751_v47 = vld [vmem:[#allocation2 + $0x34] sm:$0x1] }
 0x167   : > { %v562_v43 = vmul.f32 %v556_v50, %v2455_v21  ;;  %v559_v58 = vmul.f32 %v2441_v14, %v556_v50  ;;  %v560_v59 = vmul.f32 %v2449_v18, %v556_v50  ;;  %v557_v60 = vmul.f32 %v556_v50, %v2445_v16 }
 0x168   : > { %v552_v61 = vsel %vm548_vm4, %v545_v54, %v551_v49  ;;  %v558_v62 = vmul.f32 %v556_v50, %v2453_v20  ;;  %v561_v63 = vmul.f32 %v556_v50, %v2447_v17  ;;  %v563_v0 = vmul.f32 %v2443_v15, %v556_v50 }
 0x169   : > { %v568_v1 = vrot.slane %v552_v61, %v555_v39  ;;  %v564_v2 = vmul.f32 %v2451_v19, %v556_v50  ;;  %v1907_v21 = vrot.slane %v2489_v28, 9  ;;  %v967_v14 = vrot.slane %v2510_v51, 5  ;;  %v748_v39 = vld [vmem:[#allocation2 + $0x30] sm:$0xf] }
 0x16a   : > { %v2527_v18 = vrot.slane %v820_v52, 4  ;;  %v2529_v16 = vrot.slane %v823_v55, 5  ;;  %v730_v55 = vld [vmem:[#allocation2 + $0x18] sm:$0xf]  ;;  %vm1074_vm4 = vcmask 130144  }
 0x16b   : > { %v574_v20 = vadd.f32 %v568_v1, %v562_v43  ;;  %v571_v17 = vadd.f32 %v568_v1, %v559_v58  ;;  %v572_v5 = vadd.f32 %v568_v1, %v560_v59  ;;  %v569_v15 = vadd.f32 %v568_v1, %v557_v60 }
 0x16c   : > { %v570_v6 = vadd.f32 %v568_v1, %v558_v62  ;;  %v573_v7 = vadd.f32 %v568_v1, %v561_v63  ;;  %v575_v8 = vadd.f32 %v568_v1, %v563_v0  ;;  %v576_v19 = vadd.f32 %v568_v1, %v564_v2  ;;  %v736_v62 = vld [vmem:[#allocation2 + $0x20] sm:$0xf]  ;;  %v715_v63 = vld [vmem:[#allocation2 + $0x8] sm:$0xf] }
 0x16d   : > { %v582_v9 = vmax.f32 %v574_v20, 0.0  ;;  %v579_v10 = vmax.f32 %v571_v17, 0.0  ;;  %v580_v11 = vmax.f32 %v572_v5, 0.0  ;;  %v577_v12 = vmax.f32 %v569_v15, 0.0  ;;  %v724_v17 = vld [vmem:[#allocation2 + $0x10] sm:$0xf] }
 0x16e   : > { %v578_v13 = vmax.f32 %v570_v6, 0.0  ;;  %v581_v22 = vmax.f32 %v573_v7, 0.0  ;;  %v583_v23 = vmax.f32 %v575_v8, 0.0  ;;  %v584_v24 = vmax.f32 %v576_v19, 0.0  ;;  %v742_v8 = vld [vmem:[#allocation2 + $0x28] sm:$0xf] }
 0x16f   : > { %v1983_v25 = vpack.c.bf16 %v582_v9, %v582_v9  ;;  %v1980_v26 = vpack.c.bf16 %v579_v10, %v579_v10  ;;  %v1981_v27 = vpack.c.bf16 %v580_v11, %v580_v11  ;;  %v1978_v30 = vpack.c.bf16 %v577_v12, %v577_v12  ;;  %v721_v19 = vld [vmem:[#allocation2 + $0xc] sm:$0x1] }
 0x170   : > { %v1979_v31 = vpack.c.bf16 %v578_v13, %v578_v13  ;;  %v1982_v32 = vpack.c.bf16 %v581_v22, %v581_v22  ;;  %v2535_v33 = vpack.c.bf16 %v583_v23, %v583_v23  ;;  %v2537_v34 = vpack.c.bf16 %v584_v24, %v584_v24  ;;  %v727_v13 = vld [vmem:[#allocation2 + $0x14] sm:$0x1]  ;;  %v733_v22 = vld [vmem:[#allocation2 + $0x1c] sm:$0x1] }
 0x171   : > { %v672_v35 = vshrl.u32 %v1983_v25, 16  ;;  %v675_v36 = vshll.u32 %v1983_v25, 16  ;;  %v648_v37 = vshrl.u32 %v1980_v26, 16  ;;  %v651_v38 = vshll.u32 %v1980_v26, 16 }
 0x172   : > { %v656_v40 = vshrl.u32 %v1981_v27, 16  ;;  %v659_v41 = vshll.u32 %v1981_v27, 16  ;;  %v632_v42 = vshrl.u32 %v1978_v30, 16  ;;  %v635_v44 = vshll.u32 %v1978_v30, 16  ;;  %v739_v27 = vld [vmem:[#allocation2 + $0x24] sm:$0x1] }
 0x173   : > { %v674_v45 = vrot.slane %v672_v35, 7  ;;  %v650_v48 = vrot.slane %v648_v37, 7  ;;  %v640_v49 = vshrl.u32 %v1979_v31, 16  ;;  %v643_v50 = vshll.u32 %v1979_v31, 16  ;;  %v754_v35 = vld [vmem:[#allocation2 + $0x38] sm:$0xf] }
 0x174   : > { %v658_v54 = vrot.slane %v656_v40, 7  ;;  %v634_v56 = vrot.slane %v632_v42, 7  ;;  %v664_v57 = vshrl.u32 %v1982_v32, 16  ;;  %v667_v43 = vshll.u32 %v1982_v32, 16 }
 0x175   : > { %v677_v58 = vor.u32 %v675_v36, %v674_v45  ;;  %v678_v59 = vrot.slane %v674_v45, 4  ;;  %v653_v60 = vor.u32 %v651_v38, %v650_v48  ;;  %v654_v61 = vrot.slane %v650_v48, 4  ;;  %v757_v48 = vld [vmem:[#allocation2 + $0x3c] sm:$0x1] }
 0x176   : > { %v661_v0 = vor.u32 %v659_v41, %v658_v54  ;;  %v662_v1 = vrot.slane %v658_v54, 4  ;;  %v637_v2 = vor.u32 %v635_v44, %v634_v56  ;;  %v638_v20 = vrot.slane %v634_v56, 4  ;;  %v745_v41 = vld [vmem:[#allocation2 + $0x2c] sm:$0x1] }
 0x177   : > { %v749_v5 = vsel %vm2541_vm11, %v677_v58, %v748_v39  ;;  %v752_v15 = vsel %vm2547_vm12, %v678_v59, %v751_v47  ;;  %v731_v6 = vsel %vm2541_vm11, %v653_v60, %v730_v55  ;;  %v642_v7 = vrot.slane %v640_v49, 7  ;;  %v760_v39 = vld [vmem:[#allocation2 + $0x40] sm:$0xf]  ;;  %v763_v49 = vld [vmem:[#allocation2 + $0x44] sm:$0x1] }
 0x178   : > { %750 = vst [vmem:[#allocation2 + $0x30] sm:$0xf] %v749_v5  ;;  %753 = vst [vmem:[#allocation2 + $0x34] sm:$0x1] %v752_v15  ;;  %v737_v9 = vsel %vm2541_vm11, %v661_v0, %v736_v62  ;;  %v716_v10 = vsel %vm2541_vm11, %v637_v2, %v715_v63  ;;  %v666_v11 = vrot.slane %v664_v57, 7  ;;  %v680_v12 = vshrl.u32 %v2535_v33, 16 }
 0x179   : > { %732 = vst [vmem:[#allocation2 + $0x18] sm:$0xf] %v731_v6  ;;  %738 = vst [vmem:[#allocation2 + $0x20] sm:$0xf] %v737_v9  ;;  %v645_v23 = vor.u32 %v643_v50, %v642_v7  ;;  %v646_v24 = vrot.slane %v642_v7, 4  ;;  %v683_v25 = vshll.u32 %v2535_v33, 16  ;;  %v722_v36 = vsel %vm2547_vm12, %v638_v20, %v721_v19 }
 0x17a   : > { %717 = vst [vmem:[#allocation2 + $0x8] sm:$0xf] %v716_v10  ;;  %v688_v26 = vshrl.u32 %v2537_v34, 16  ;;  %v669_v30 = vor.u32 %v667_v43, %v666_v11  ;;  %v682_v31 = vrot.slane %v680_v12, 7  ;;  %v691_v32 = vshll.u32 %v2537_v34, 16 }
 0x17b   : > { %v725_v37 = vsel %vm2541_vm11, %v645_v23, %v724_v17  ;;  %723 = vst [vmem:[#allocation2 + $0xc] sm:$0x1] %v722_v36  ;;  %v728_v33 = vsel %vm2547_vm12, %v646_v24, %v727_v13  ;;  %v734_v34 = vsel %vm2547_vm12, %v654_v61, %v733_v22  ;;  %v670_v45 = vrot.slane %v666_v11, 4 }
 0x17c   : > { %v690_v38 = vrot.slane %v688_v26, 7  ;;  %726 = vst [vmem:[#allocation2 + $0x10] sm:$0xf] %v725_v37  ;;  %v743_v42 = vsel %vm2541_vm11, %v669_v30, %v742_v8  ;;  %v685_v44 = vor.u32 %v683_v25, %v682_v31  ;;  %729 = vst [vmem:[#allocation2 + $0x14] sm:$0x1] %v728_v33  ;;  %v740_v47 = vsel %vm2547_vm12, %v662_v1, %v739_v27 }
 0x17d   : > { %735 = vst [vmem:[#allocation2 + $0x1c] sm:$0x1] %v734_v34  ;;  %744 = vst [vmem:[#allocation2 + $0x28] sm:$0xf] %v743_v42  ;;  %v686_v54 = vrot.slane %v682_v31, 4  ;;  %v2597_v43 = vsel %vm2573_vm13, %v1907_v21, %v967_v14  ;;  %v746_v58 = vsel %vm2547_vm12, %v670_v45, %v745_v41 }
 0x17e   : > { %v693_v50 = vor.u32 %v691_v32, %v690_v38  ;;  %741 = vst [vmem:[#allocation2 + $0x24] sm:$0x1] %v740_v47  ;;  %v694_v55 = vrot.slane %v690_v38, 4  ;;  %v755_v57 = vsel %vm2541_vm11, %v685_v44, %v754_v35  ;;  %747 = vst [vmem:[#allocation2 + $0x2c] sm:$0x1] %v746_v58 }
 0x17f   : > { %756 = vst [vmem:[#allocation2 + $0x38] sm:$0xf] %v755_v57  ;;  %v758_v51 = vsel %vm2547_vm12, %v686_v54, %v757_v48  ;;  %v2650_v23 = vld [vmem:[#allocation2 + $0x30] sm:$0xf]  ;;  %v2833_v53 = vld [vmem:[#allocation2 + $0x34] sm:$0x1] }
 0x180   : > { %v2602_v60 = vld [vmem:[#allocation2 + $0x18] sm:$0xf]  ;;  %v761_v61 = vsel %vm2541_vm11, %v693_v50, %v760_v39  ;;  %v764_v62 = vsel %vm2547_vm12, %v694_v55, %v763_v49  ;;  %v2611_v14 = vld [vmem:[#allocation2 + $0x20] sm:$0xf]  ;;  %759 = vst [vmem:[#allocation2 + $0x3c] sm:$0x1] %v758_v51 }
 0x181   : > { %v1108_v63 = vshrl.u32 %v2602_v60, 16  ;;  %v1111_v0 = vshll.u32 %v2602_v60, 16  ;;  %v2615_v1 = vld [vmem:[#allocation2 + $0x8] sm:$0xf]  ;;  %762 = vst [vmem:[#allocation2 + $0x40] sm:$0xf] %v761_v61  ;;  %v1920_v2 = vcombine.low %v2602_v60, %v2611_v14 }
 0x182   : > { %765 = vst [vmem:[#allocation2 + $0x44] sm:$0x1] %v764_v62  ;;  %v1122_v20 = vshrl.u32 %v2611_v14, 16  ;;  %v1125_v17 = vshll.u32 %v2611_v14, 16  ;;  %v1080_v5 = vshrl.u32 %v2615_v1, 16  ;;  %v1083_v8 = vshll.u32 %v2615_v1, 16 }
 0x183   : > { %v2630_v15 = vld [vmem:[#allocation2 + $0x20] sm:$0xf]  ;;  %v2632_v6 = vrot.slane %v1108_v63, 4  ;;  %v2634_v7 = vrot.slane %v1111_v0, 5  ;;  %v2638_v9 = vld [vmem:[#allocation2 + $0x18] sm:$0xf]  ;;  %1064 = vrot.lane.b32.xlu1 %v1920_v2, %s2225_s12 }
 0x184   : > { %v2640_v10 = vrot.slane %v1122_v20, 4  ;;  %v2642_v11 = vrot.slane %v1125_v17, 5  ;;  %v2645_v12 = vld [vmem:[#allocation2 + $0x10] sm:$0xf]  ;;  %v2647_v13 = vrot.slane %v1080_v5, 4  ;;  %v2654_v25 = vrot.slane %v1083_v8, 5 }
 0x185   : > { %v1919_v24 = vcombine.low %v2615_v1, %v2645_v12  ;;  %v1094_v26 = vshrl.u32 %v2645_v12, 16  ;;  %v1097_v27 = vshll.u32 %v2645_v12, 16  ;;  %v2658_v30 = vld [vmem:[#allocation2 + $0x28] sm:$0xf]  ;;  %v2664_v36 = vld [vmem:[#allocation2 + $0x10] sm:$0xf] }
 0x186   : > { %v1940_v31 = vcombine.low %v2630_v15, %v2658_v30  ;;  %v2667_v38 = vld [vmem:[#allocation2 + $0x30] sm:$0xf]  ;;  %v1939_v34 = vcombine.low %v2664_v36, %v2638_v9  ;;  %v2677_v42 = vld [vmem:[#allocation2 + $0x38] sm:$0xf]  ;;  %v2690_v57 = vld [vmem:[#allocation2 + $0x28] sm:$0xf] }
 0x187   : > { %3234 = vst [vmem:[#allocation15_spill] sm:$0xff] %v2667_v38  ;;  %v2669_v39 = vrot.slane %v1094_v26, 4  ;;  %v2671_v33 = vrot.slane %v1097_v27, 5  ;;  %1062 = vrot.lane.b32.xlu0 %v1919_v24, %s2225_s12  ;;  %v1921_v61 = vcombine.low %v2690_v57, %v2650_v23  ;;  %v2705_v5 = vld [vmem:[#allocation2 + $0x38] sm:$0xf]  ;;  %v1927_v21 = vrot.slane %v2615_v1, 9 }
 0x188   : > { %1328 = vrot.lane.b32.xlu1 %v1940_v31, %s2226_s24  ;;  %v2682_v47 = vld [vmem:[#allocation2 + $0x40] sm:$0xf]  ;;  %3236 = vst [vmem:[#allocation17_spill] sm:$0xff] %v2705_v5  ;;  %v1941_v24 = vcombine.low %v2667_v38, %v2705_v5  ;;  %v2716_v59 = vld [vmem:[#allocation2 + $0x14] sm:$0x1]  ;;  %v1928_v8 = vrot.slane %v2645_v12, 9 }
 0x189   : > { %v1922_v50 = vcombine.low %v2677_v42, %v2682_v47  ;;  %v2698_v0 = vld [vmem:[#allocation2 + $0x40] sm:$0xf]  ;;  %v1234_v17 = vrot.slane %v2716_v59, 5  ;;  %v2723_v20 = vld [vmem:[#allocation2 + $0x8] sm:$0xf]  ;;  %v1948_v31 = vrot.slane %v2638_v9, 9 }
 0x18a   : > { %3235 = vst [vmem:[#allocation16_spill] sm:$0xff] %v2698_v0  ;;  %v1942_v2 = vcombine.low %v2698_v0, %v2491_v29  ;;  %v2725_v26 = vld [vmem:[#allocation2 + $0xc] sm:$0x1]  ;;  %v1908_v63 = vrot.slane %v2723_v20, 9  ;;  %v2737_v62 = vld [vmem:[#allocation2 + $0x14] sm:$0x1] }
 0x18b   : > { %1326 = vrot.lane.b32.xlu0 %v1939_v34, %s2226_s24  ;;  %v2714_v34 = vld [vmem:[#allocation2 + $0xc] sm:$0x1]  ;;  %v971_v58 = vrot.slane %v2725_v26, 5  ;;  %v2739_v51 = vld [vmem:[#allocation2 + $0x1c] sm:$0x1]  ;;  %v1235_v54 = vsel %vm2573_vm13, %v1928_v8, %v1234_v17  ;;  %v1930_v35 = vrot.slane %v2611_v14, 9 }
 0x18c   : > { %1068 = vrot.lane.b32.xlu1 %v1922_v50, %s2225_s12  ;;  %v1230_v52 = vrot.slane %v2714_v34, 5  ;;  %v1947_v50 = vrot.slane %v2664_v36, 9  ;;  %v2750_v49 = vld [vmem:[#allocation2 + $0x14] sm:$0x1]  ;;  %v2756_v44 = vld [vmem:[#allocation2 + $0x18] sm:$0xf] }
 0x18d   : > { %v972_v37 = vsel %vm2573_vm13, %v1908_v63, %v971_v58  ;;  %v975_v8 = vrot.slane %v2750_v49, 5  ;;  %v2770_v58 = vld [vmem:[#allocation2 + $0x2c] sm:$0x1]  ;;  %v2799_v1 = vld [vmem:[#allocation2 + $0x28] sm:$0xf]  ;;  %3237 = vst [vmem:[#allocation18_spill] sm:$0xff] %v2833_v53 }
 0x18e   : > { %v1231_v12 = vsel %vm2573_vm13, %v1927_v21, %v1230_v52  ;;  %v1498_v21 = vrot.slane %v2739_v51, 5  ;;  %v2748_v52 = vld [vmem:[#allocation2 + $0x10] sm:$0xf]  ;;  %v1915_v41 = vcombine.low %v2597_v43, %v972_v37  ;;  %v1949_v37 = vrot.slane %v2630_v15, 9  ;;  %v2801_v27 = vld [vmem:[#allocation2 + $0x2c] sm:$0x1] }
 0x18f   : > { %1066 = vrot.lane.b32.xlu0 %v1921_v61, %s2225_s12  ;;  %v1494_v61 = vrot.slane %v2737_v62, 5  ;;  %v1935_v45 = vcombine.low %v1231_v12, %v1235_v54  ;;  %v1909_v17 = vrot.slane %v2748_v52, 9  ;;  %v1910_v54 = vrot.slane %v2756_v44, 9  ;;  %v2768_v12 = vld [vmem:[#allocation2 + $0x24] sm:$0x1]  ;;  %s2233_s12 = smov [#allocation7]  }
 0x190   : > { %1332 = vrot.lane.b32.xlu1 %v1942_v2, %s2226_s24  ;;  %v2758_v2 = vld [vmem:[#allocation2 + $0x1c] sm:$0x1]  ;;  %v1499_v48 = vsel %vm2573_vm13, %v1948_v31, %v1498_v21  ;;  %v1502_v31 = vrot.slane %v2768_v12, 5  ;;  %v1950_v21 = vrot.slane %v2658_v30, 9  ;;  %v1932_v3 = vrot.slane %v2650_v23, 9 }
 0x191   : > { %v1495_v55 = vsel %vm2573_vm13, %v1947_v50, %v1494_v61  ;;  %v976_v46 = vsel %vm2573_vm13, %v1909_v17, %v975_v8  ;;  %v979_v43 = vrot.slane %v2758_v2, 5  ;;  %v2777_v50 = vld [vmem:[#allocation2 + $0x1c] sm:$0x1]  ;;  %v2779_v61 = vld [vmem:[#allocation2 + $0x24] sm:$0x1]  ;;  %v1934_v38 = vrot.slane %v2682_v47, 9 }
 0x192   : > { %v1955_v63 = vcombine.low %v1495_v55, %v1499_v48  ;;  %v1506_v48 = vrot.slane %v2770_v58, 5  ;;  %v1929_v55 = vrot.slane %v2602_v60, 9  ;;  %v1238_v8 = vrot.slane %v2777_v50, 5  ;;  %v2845_v5 = vld [vmem:[#allocation2 + $0x44] sm:$0x1] }
 0x193   : > { %1330 = vrot.lane.b32.xlu0 %v1941_v24, %s2226_s24  ;;  %v2786_v24 = vld [vmem:[#allocation2 + $0x20] sm:$0xf]  ;;  %v980_v17 = vsel %vm2573_vm13, %v1910_v54, %v979_v43  ;;  %v1242_v32 = vrot.slane %v2779_v61, 5  ;;  %v1503_v19 = vsel %vm2573_vm13, %v1949_v37, %v1502_v31  ;;  %v2810_v31 = vld [vmem:[#allocation2 + $0x30] sm:$0xf]  ;;  %v1258_v0 = vrot.slane %v2845_v5, 5 }
 0x194   : > { %1009 = vrot.lane.b32.xlu1 %v1915_v41, %s2227_s20  ;;  %v2793_v41 = vld [vmem:[#allocation2 + $0x24] sm:$0x1]  ;;  %v1916_v22 = vcombine.low %v976_v46, %v980_v17  ;;  %v1507_v60 = vsel %vm2573_vm13, %v1950_v21, %v1506_v48  ;;  %v1911_v54 = vrot.slane %v2786_v24, 9  ;;  %v1239_v43 = vsel %vm2573_vm13, %v1929_v55, %v1238_v8  ;;  %v2812_v21 = vld [vmem:[#allocation2 + $0x34] sm:$0x1]  ;;  %s2157_s24 = sshll.u32 %s2233_s12, 4  ;;  %s2158_s24 = int_to_ptr.vmem [resolvable:$false] %s2157_s24 }
 0x195   : > { %v1956_v14 = vcombine.low %v1503_v19, %v1507_v60  ;;  %v1243_v46 = vsel %vm2573_vm13, %v1930_v35, %v1242_v32  ;;  %v983_v37 = vrot.slane %v2793_v41, 5  ;;  %v1912_v17 = vrot.slane %v2799_v1, 9  ;;  %v2817_v19 = vld [vmem:[#allocation2 + $0x38] sm:$0xf]  ;;  %v2819_v60 = vld [vmem:[#allocation2 + $0x3c] sm:$0x1] }
 0x196   : > { %v1936_v48 = vcombine.low %v1239_v43, %v1243_v46  ;;  %v1899_v32 = vcombine.low %v2489_v28, %v2723_v20  ;;  %v1913_v55 = vrot.slane %v2810_v31, 9  ;;  %v991_v8 = vrot.slane %v2812_v21, 5  ;;  %v2828_v43 = vld [vmem:[#allocation2 + $0x2c] sm:$0x1] }
 0x197   : > { %1272 = vrot.lane.b32.xlu0 %v1935_v45, %s2228_s21  ;;  %v987_v45 = vrot.slane %v2801_v27, 5  ;;  %v984_v35 = vsel %vm2573_vm13, %v1911_v54, %v983_v37  ;;  %v995_v29 = vrot.slane %v2819_v60, 5  ;;  %v1931_v28 = vrot.slane %v2690_v57, 9 }
 0x198   : > { %1011 = vrot.lane.b32.xlu1 %v1916_v22, %s2227_s20  ;;  %v1914_v22 = vrot.slane %v2817_v19, 9  ;;  %v1246_v4 = vrot.slane %v2828_v43, 5  ;;  %806 = vst.msk [vmem:[#allocation3] sm:$0xff] %vm477_vm3, %v1899_v32  ;;  %v992_v37 = vsel %vm2573_vm13, %v1913_v55, %v991_v8  ;;  %v1902_v56 = vcombine.low %v2810_v31, %v2817_v19 }
 0x199   : > { %v988_v46 = vsel %vm2573_vm13, %v1912_v17, %v987_v45  ;;  %v1250_v17 = vrot.slane %v2833_v53, 5  ;;  %v2843_v45 = vld [vmem:[#allocation2 + $0x3c] sm:$0x1] }
 0x19a   : > { %v1917_v54 = vcombine.low %v984_v35, %v988_v46  ;;  %v996_v32 = vsel %vm2573_vm13, %v1914_v22, %v995_v29  ;;  %v1933_v35 = vrot.slane %v2677_v42, 9  ;;  %v1254_v55 = vrot.slane %v2843_v45, 5  ;;  %809 = vst.msk [vmem:[#allocation3 + $0x18] sm:$0xff] %vm477_vm3, %v1902_v56 }
 0x19b   : > { %1536 = vrot.lane.b32.xlu0 %v1955_v63, %s2229_s11  ;;  %v1247_v63 = vsel %vm2573_vm13, %v1931_v28, %v1246_v4  ;;  %v1918_v8 = vcombine.low %v992_v37, %v996_v32  ;;  %v1251_v46 = vsel %vm2573_vm13, %v1932_v3, %v1250_v17  ;;  %v3238_v29 = vor.u32 %v2634_v7, %v2632_v6 }
 0x19c   : > { %1274 = vrot.lane.b32.xlu1 %v1936_v48, %s2228_s21  ;;  %v1937_v53 = vcombine.low %v1247_v63, %v1251_v46  ;;  %v1255_v48 = vsel %vm2573_vm13, %v1933_v35, %v1254_v55  ;;  %v1117_v22 = vshll.u32 %v2777_v50, 16  ;;  %v1259_v28 = vsel %vm2573_vm13, %v1934_v38, %v1258_v0 }
 0x19d   : > { %v1115_v4 = vrot.slane %v3238_v29, 4  ;;  %v3239_v3 = vor.u32 %v2642_v11, %v2640_v10  ;;  %v1131_v17 = vshll.u32 %v2779_v61, 16  ;;  %v828_v32 = vshrl.u32 %v2723_v20, 16 }
 0x19e   : > { %v1938_v63 = vcombine.low %v1255_v48, %v1259_v28  ;;  %v1119_v6 = vrot.slane %v1117_v22, 5  ;;  %v831_v7 = vshll.u32 %v2723_v20, 16  ;;  %v837_v50 = vshll.u32 %v2725_v26, 16 }
 0x19f   : > { %1538 = vrot.lane.b32.xlu0 %v1956_v14, %s2229_s11  ;;  %v1129_v37 = vrot.slane %v3239_v3, 4  ;;  %v1133_v14 = vrot.slane %v1131_v17, 5  ;;  %v830_v35 = vrot.slane %v828_v32, 4  ;;  %v3240_v38 = vshrl.u32 %v2630_v15, 16 }
 0x1a0   : > { %1015 = vrot.lane.b32.xlu1 %v1918_v8, %s2227_s20  ;;  %v3241_v10 = vshll.u32 %v2630_v15, 16  ;;  %v1120_v61 = vsel %vm2585_vm14, %v1115_v4, %v1119_v6  ;;  %v833_v55 = vrot.slane %v831_v7, 5  ;;  %v839_v46 = vrot.slane %v837_v50, 5 }
 0x1a1   : > { %v1374_v0 = vrot.slane %v3240_v38, 4  ;;  %v1381_v8 = vshll.u32 %v2768_v12, 16  ;;  %v1134_v20 = vsel %vm2585_vm14, %v1129_v37, %v1133_v14  ;;  %v3242_v48 = vshrl.u32 %v2658_v30, 16 }
 0x1a2   : > { %v1377_v11 = vrot.slane %v3241_v10, 5  ;;  %v3243_v22 = vshll.u32 %v2658_v30, 16  ;;  %v1924_v28 = vcombine.low %v1120_v61, %v1134_v20  ;;  %v834_v4 = vor.u32 %v833_v55, %v830_v35 }
 0x1a3   : > { %1013 = vrot.lane.b32.xlu0 %v1917_v54, %s2227_s20  ;;  %v1388_v29 = vrot.slane %v3242_v48, 4  ;;  %v1383_v3 = vrot.slane %v1381_v8, 5  ;;  %v1395_v17 = vshll.u32 %v2770_v58, 16  ;;  %v842_v54 = vshrl.u32 %v2748_v52, 16 }
 0x1a4   : > { %v1378_v26 = vor.u32 %v1377_v11, %v1374_v0  ;;  %v1391_v15 = vrot.slane %v3243_v22, 5  ;;  %1278 = vrot.lane.b32.xlu1 %v1938_v63, %s2228_s21  ;;  %v845_v37 = vshll.u32 %v2748_v52, 16  ;;  %v835_v6 = vrot.slane %v834_v4, 4 }
 0x1a5   : > { %v1397_v7 = vrot.slane %v1395_v17, 5  ;;  %v851_v50 = vshll.u32 %v2750_v49, 16  ;;  %v856_v30 = vshrl.u32 %v2756_v44, 16  ;;  %v844_v35 = vrot.slane %v842_v54, 4 }
 0x1a6   : > { %v1379_v12 = vrot.slane %v1378_v26, 4  ;;  %v1392_v32 = vor.u32 %v1391_v15, %v1388_v29  ;;  %v847_v58 = vrot.slane %v845_v37, 5  ;;  %v840_v38 = vsel %vm2585_vm14, %v835_v6, %v839_v46 }
 0x1a7   : > { %1276 = vrot.lane.b32.xlu0 %v1937_v53, %s2228_s21  ;;  %v853_v0 = vrot.slane %v851_v50, 5  ;;  %v858_v10 = vrot.slane %v856_v30, 4  ;;  %v859_v49 = vshll.u32 %v2756_v44, 16  ;;  %v3244_v53 = vsel %vm2585_vm14, %v2527_v18, %v2529_v16  ;;  %s2159_s21 = scalar_lea.vmem %s2158_s24, 2048 }
 0x1a8   : > { %v1384_v63 = vsel %vm2585_vm14, %v1379_v12, %v1383_v3  ;;  %v1393_v14 = vrot.slane %v1392_v32, 4  ;;  %1205 = vrot.lane.b32.xlu1 %v1924_v28, %s2230_s30  ;;  %v1903_v11 = vcombine.low %v3244_v53, %v840_v38  ;;  %v848_v55 = vor.u32 %v847_v58, %v844_v35  ;;  %v2110_v3 = vld [vmem:[%s3199_s6] sm:$0xff]  }
 0x1a9   : > { %v865_v8 = vshll.u32 %v2758_v2, 16  ;;  %v861_v26 = vrot.slane %v859_v49, 5  ;;  %v870_v46 = vshrl.u32 %v2786_v24, 16  ;;  %v873_v48 = vshll.u32 %v2786_v24, 16  ;;  %2014 = vmatprep.subr.bf16.mxu1 %v2110_v3 }
 0x1aa   : > { %v1398_v61 = vsel %vm2585_vm14, %v1393_v14, %v1397_v7  ;;  %v849_v29 = vrot.slane %v848_v55, 4  ;;  %v879_v18 = vshll.u32 %v2793_v41, 16  ;;  %v884_v16 = vshrl.u32 %v2799_v1, 16  ;;  %2015 = vmatpush3.bf16.msra.mxu1 %v2110_v3 }
 0x1ab   : > { %v1944_v20 = vcombine.low %v1384_v63, %v1398_v61  ;;  %937 = vrot.lane.b32.xlu0 %v1903_v11, %s2231_s29  ;;  %v867_v22 = vrot.slane %v865_v8, 5  ;;  %v862_v15 = vor.u32 %v861_v26, %v858_v10  ;;  %v872_v2 = vrot.slane %v870_v46, 4 }
 0x1ac   : > { %v875_v28 = vrot.slane %v873_v48, 5  ;;  %v887_v4 = vshll.u32 %v2799_v1, 16  ;;  %v854_v17 = vsel %vm2585_vm14, %v849_v29, %v853_v0  ;;  %v881_v12 = vrot.slane %v879_v18, 5 }
 0x1ad   : > { %1469 = vrot.lane.b32.xlu1 %v1944_v20, %s2232_s28  ;;  %v886_v32 = vrot.slane %v884_v16, 4  ;;  %v893_v41 = vshll.u32 %v2801_v27, 16  ;;  %v863_v54 = vrot.slane %v862_v15, 4  ;;  %v3245_v7 = vor.u32 %v2654_v25, %v2647_v13 }
 0x1ae   : > { %v876_v37 = vor.u32 %v875_v28, %v872_v2  ;;  %v889_v6 = vrot.slane %v887_v4, 5  ;;  %v1089_v63 = vshll.u32 %v2714_v34, 16  ;;  %v3246_v14 = vor.u32 %v2671_v33, %v2669_v39 }
 0x1af   : > { %v1087_v50 = vrot.slane %v3245_v7, 4  ;;  %v895_v30 = vrot.slane %v893_v41, 5  ;;  %v1103_v58 = vshll.u32 %v2716_v59, 16  ;;  %v868_v27 = vsel %vm2585_vm14, %v863_v54, %v867_v22 }
 0x1b0   : > { %v1101_v35 = vrot.slane %v3246_v14, 4  ;;  %v877_v38 = vrot.slane %v876_v37, 4  ;;  %v890_v0 = vor.u32 %v889_v6, %v886_v32  ;;  %v898_v10 = vshrl.u32 %v2810_v31, 16 }
 0x1b1   : > { %v1904_v13 = vcombine.low %v854_v17, %v868_v27  ;;  %v1091_v25 = vrot.slane %v1089_v63, 5  ;;  %v1105_v49 = vrot.slane %v1103_v58, 5  ;;  %v901_v53 = vshll.u32 %v2810_v31, 16 }
 0x1b2   : > { %v882_v34 = vsel %vm2585_vm14, %v877_v38, %v881_v12  ;;  %v891_v39 = vrot.slane %v890_v0, 4  ;;  %v900_v33 = vrot.slane %v898_v10, 4  ;;  %v907_v59 = vshll.u32 %v2812_v21, 16  ;;  %v2111_v21 = vld [vmem:[%s3199_s6 + $0x8] sm:$0xff]  }
 0x1b3   : > { %939 = vrot.lane.b32.xlu0 %v1904_v13, %s2231_s29  ;;  %v1092_v11 = vsel %vm2585_vm14, %v1087_v50, %v1091_v25  ;;  %v1106_v61 = vsel %vm2585_vm14, %v1101_v35, %v1105_v49  ;;  %v903_v55 = vrot.slane %v901_v53, 5  ;;  %v912_v8 = vshrl.u32 %v2817_v19, 16  ;;  %2016 = vmatprep.subr.bf16.mxu1 %v2111_v21 }
 0x1b4   : > { %v896_v20 = vsel %vm2585_vm14, %v891_v39, %v895_v30  ;;  %v1923_v26 = vcombine.low %v1092_v11, %v1106_v61  ;;  %v909_v46 = vrot.slane %v907_v59, 5  ;;  %v915_v48 = vshll.u32 %v2817_v19, 16  ;;  %2017 = vmatpush3.bf16.msra.mxu1 %v2111_v21 }
 0x1b5   : > { %v1905_v29 = vcombine.low %v882_v34, %v896_v20  ;;  %v904_v22 = vor.u32 %v903_v55, %v900_v33  ;;  %v914_v18 = vrot.slane %v912_v8, 4  ;;  %v921_v16 = vshll.u32 %v2819_v60, 16 }
 0x1b6   : > { %v917_v15 = vrot.slane %v915_v48, 5  ;;  %v3247_v2 = vshrl.u32 %v2664_v36, 16  ;;  %v3248_v4 = vshll.u32 %v2664_v36, 16  ;;  %v1353_v17 = vshll.u32 %v2737_v62, 16  ;;  %v1303_v48 = vld [vmem:[#allocation2 + $0x44] sm:$0x1] }
 0x1b7   : > { %941 = vrot.lane.b32.xlu1 %v1905_v29, %s2231_s29  ;;  %1203 = vrot.lane.b32.xlu0 %v1923_v26, %s2230_s30  ;;  %v905_v12 = vrot.slane %v904_v22, 4  ;;  %v923_v32 = vrot.slane %v921_v16, 5  ;;  %v3249_v41 = vshrl.u32 %v2638_v9, 16  ;;  %v3250_v60 = vshll.u32 %v2638_v9, 16 }
 0x1b8   : > { %v1346_v28 = vrot.slane %v3247_v2, 4  ;;  %v1349_v3 = vrot.slane %v3248_v4, 5  ;;  %v918_v6 = vor.u32 %v917_v15, %v914_v18  ;;  %v1355_v50 = vrot.slane %v1353_v17, 5  ;;  %v3260_v4 = vld [vmem:[#allocation16_spill] sm:$0xff] }
 0x1b9   : > { %v1360_v54 = vrot.slane %v3249_v41, 4  ;;  %v1363_v37 = vrot.slane %v3250_v60, 5  ;;  %v1367_v36 = vshll.u32 %v2739_v51, 16  ;;  %v910_v62 = vsel %vm2585_vm14, %v905_v12, %v909_v46  ;;  %v1299_v60 = vld [vmem:[#allocation2 + $0x34] sm:$0x1] }
 0x1ba   : > { %v1350_v7 = vor.u32 %v1349_v3, %v1346_v28  ;;  %v3251_v63 = vshrl.u32 %v2677_v42, 16  ;;  %v3252_v35 = vshll.u32 %v2677_v42, 16  ;;  %v919_v27 = vrot.slane %v918_v6, 4 }
 0x1bb   : > { %v1364_v30 = vor.u32 %v1363_v37, %v1360_v54  ;;  %v1369_v9 = vrot.slane %v1367_v36, 5  ;;  %v1173_v0 = vshll.u32 %v2843_v45, 16  ;;  %v3253_v51 = vshrl.u32 %v2682_v47, 16 }
 0x1bc   : > { %v1166_v14 = vrot.slane %v3251_v63, 4  ;;  %v1169_v58 = vrot.slane %v3252_v35, 5  ;;  %v1351_v38 = vrot.slane %v1350_v7, 4  ;;  %v3254_v49 = vshll.u32 %v2682_v47, 16 }
 0x1bd   : > { %v1365_v10 = vrot.slane %v1364_v30, 4  ;;  %v1180_v25 = vrot.slane %v3253_v51, 4  ;;  %v924_v34 = vsel %vm2585_vm14, %v919_v27, %v923_v32  ;;  %v1175_v39 = vrot.slane %v1173_v0, 5  ;;  %v3263_v30 = vld [vmem:[#allocation15_spill] sm:$0xff]  ;;  %v3266_v0 = vld [vmem:[#allocation17_spill] sm:$0xff] }
 0x1be   : > { %v1170_v13 = vor.u32 %v1169_v58, %v1166_v14  ;;  %v1183_v53 = vrot.slane %v3254_v49, 5  ;;  %v1356_v42 = vsel %vm2585_vm14, %v1351_v38, %v1355_v50  ;;  %v1187_v33 = vshll.u32 %v2845_v5, 16 }
 0x1bf   : > { %v1906_v59 = vcombine.low %v910_v62, %v924_v34  ;;  %v1370_v45 = vsel %vm2585_vm14, %v1365_v10, %v1369_v9  ;;  %v3255_v47 = vshrl.u32 %v2690_v57, 16  ;;  %v3256_v26 = vshll.u32 %v2690_v57, 16  ;;  %v3259_v57 = vld [vmem:[#allocation18_spill] sm:$0xff] }
 0x1c0   : > { %v1171_v11 = vrot.slane %v1170_v13, 4  ;;  %v1184_v61 = vor.u32 %v1183_v53, %v1180_v25  ;;  %v1943_v55 = vcombine.low %v1356_v42, %v1370_v45  ;;  %v1189_v8 = vrot.slane %v1187_v33, 5 }
 0x1c1   : > { %v1138_v20 = vrot.slane %v3255_v47, 4  ;;  %v1141_v46 = vrot.slane %v3256_v26, 5  ;;  %943 = vrot.lane.b32.xlu1 %v1906_v59, %s2231_s29  ;;  %v1145_v29 = vshll.u32 %v2828_v43, 16  ;;  %v3257_v22 = vshrl.u32 %v2650_v23, 16  ;;  %v3270_v47 = vld [vmem:[#allocation14_spill] sm:$0xff]  ;;  %s3119_s29 = scalar_lea.vmem [#allocation7], %s1884_s27 }
 0x1c2   : > { %v1176_v5 = vsel %vm2585_vm14, %v1171_v11, %v1175_v39  ;;  %v1185_v21 = vrot.slane %v1184_v61, 4  ;;  %1467 = vrot.lane.b32.xlu0 %v1943_v55, %s2232_s28  ;;  %v3258_v15 = vshll.u32 %v2650_v23, 16  ;;  %v1159_v28 = vshll.u32 %v3259_v57, 16  ;;  %v1301_v23 = vld [vmem:[#allocation2 + $0x3c] sm:$0x1]  ;;  %s1986_s27 = sshll.u32 %s2311_s17, 10 }
 0x1c3   : > { %v1152_v18 = vrot.slane %v3257_v22, 4  ;;  %v1142_v16 = vor.u32 %v1141_v46, %v1138_v20  ;;  %v3261_v3 = vshrl.u32 %v3260_v4, 16  ;;  %v1147_v32 = vrot.slane %v1145_v29, 5  ;;  %v3274_v22 = vld [vmem:[#allocation11_spill] sm:$0xff]  ;;  %s3140_s22 = scalar_lea.hbm %s3203_s10, %s1986_s27  ;;  %s1791_s17 = scalar_lea.sflag [#allocation6], %s2394_s18 }
 0x1c4   : > { %v1155_v2 = vrot.slane %v3258_v15, 5  ;;  %v1190_v12 = vsel %vm2585_vm14, %v1185_v21, %v1189_v8  ;;  %v3262_v43 = vshll.u32 %v3260_v4, 16  ;;  %v1437_v54 = vshll.u32 %v1303_v48, 16  ;;  %v3269_v8 = vld [vmem:[#allocation13_spill] sm:$0xff]  ;;  %v3272_v21 = vld [vmem:[#allocation12_spill] sm:$0xff] }
 0x1c5   : > { %v1430_v17 = vrot.slane %v3261_v3, 4  ;;  %v1926_v37 = vcombine.low %v1176_v5, %v1190_v12  ;;  %v1143_v6 = vrot.slane %v1142_v16, 4  ;;  %v1161_v50 = vrot.slane %v1159_v28, 5  ;;  %v2112_v12 = vld [vmem:[%s3199_s6 + $0x10] ss:$0 sps:$4 sm:$0x33]  }
 0x1c6   : > { %v1433_v41 = vrot.slane %v3262_v43, 5  ;;  %v1156_v7 = vor.u32 %v1155_v2, %v1152_v18  ;;  %v1439_v62 = vrot.slane %v1437_v54, 5  ;;  %v3264_v63 = vshrl.u32 %v3263_v30, 16  ;;  %2040 = vmatprep.subr.msk.bf16.mxu1 %vm1597_vm15, %v2112_v12 }
 0x1c7   : > { %v3265_v35 = vshll.u32 %v3263_v30, 16  ;;  %1209 = vrot.lane.b32.xlu1 %v1926_v37, %s2230_s30  ;;  %v1148_v27 = vsel %vm2585_vm14, %v1143_v6, %v1147_v32  ;;  %v1409_v9 = vshll.u32 %v1299_v60, 16  ;;  %v3267_v10 = vshrl.u32 %v3266_v0, 16 }
 0x1c8   : > { %v1434_v36 = vor.u32 %v1433_v41, %v1430_v17  ;;  %v1402_v14 = vrot.slane %v3264_v63, 4  ;;  %v1157_v38 = vrot.slane %v1156_v7, 4  ;;  %v3268_v49 = vshll.u32 %v3266_v0, 16 }
 0x1c9   : > { %v1405_v58 = vrot.slane %v3265_v35, 5  ;;  %v1416_v13 = vrot.slane %v3267_v10, 4  ;;  %v1423_v34 = vshll.u32 %v1301_v23, 16  ;;  %v1411_v39 = vrot.slane %v1409_v9, 5 }
 0x1ca   : > { %v1435_v51 = vrot.slane %v1434_v36, 4  ;;  %v1419_v53 = vrot.slane %v3268_v49, 5  ;;  %v1162_v42 = vsel %vm2585_vm14, %v1157_v38, %v1161_v50  ;;  %v1953_v33 = vrot.slane %v3260_v4, 9 }
 0x1cb   : > { %v1406_v25 = vor.u32 %v1405_v58, %v1402_v14  ;;  %v1518_v59 = vrot.slane %v1303_v48, 5  ;;  %v1925_v45 = vcombine.low %v1148_v27, %v1162_v42  ;;  %v3271_v20 = vsel %vm2585_vm14, %v3269_v8, %v3270_v47  ;;  %v1678_v8 = vld [vmem:[%s3201_s8] sm:$0x3] }
 0x1cc   : > { %v1440_v11 = vsel %vm2585_vm14, %v1435_v51, %v1439_v62  ;;  %v1420_v55 = vor.u32 %v1419_v53, %v1416_v13  ;;  %v1425_v46 = vrot.slane %v1423_v34, 5  ;;  %v3273_v29 = vrot.slane %v3272_v21, 5  ;;  %2041 = vmatprep.subr.msk.bf16.mxu0 %vm1597_vm15, %v1678_v8 }
 0x1cd   : > { %v1407_v61 = vrot.slane %v1406_v25, 4  ;;  %v1946_v26 = vcombine.low %v1440_v11, %v3271_v20  ;;  %v1519_v5 = vsel %vm2573_vm13, %v1953_v33, %v1518_v59  ;;  %v3275_v48 = vrot.slane %v3274_v22, 9  ;;  %1207 = vrot.lane.b32.xlu0 %v1925_v45, %s2230_s30  ;;  %v1959_v20 = vld [vmem:[%s3200_s7] ss:$0 sm:$0xff]  ;;  %s1804_s30 = sshll.u32 %s3119_s29, 4  ;;  %s3144_s30 = int_to_ptr.vmem [resolvable:$true] %s1804_s30 }
 0x1ce   : > { %v1421_v15 = vrot.slane %v1420_v55, 4  ;;  %v1951_v2 = vrot.slane %v3263_v30, 9  ;;  %v1510_v57 = vrot.slane %v1299_v60, 5  ;;  %v1952_v28 = vrot.slane %v3266_v0, 9  ;;  %p2160_p8 = scmp.lt.s32.totalorder %s3144_s30, %s2158_s24 }
 0x1cf   : > { %v1523_v18 = vsel %vm2573_vm13, %v3275_v48, %v3273_v29  ;;  %v1412_v16 = vsel %vm2585_vm14, %v1407_v61, %v1411_v39  ;;  %1473 = vrot.lane.b32.xlu1 %v1946_v26, %s2232_s28  ;;  %v1514_v4 = vrot.slane %v1301_v23, 5  ;;  %v1900_v17 = vcombine.low %v2748_v52, %v2756_v44 }
 0x1d0   : > { %v1426_v3 = vsel %vm2585_vm14, %v1421_v15, %v1425_v46  ;;  %v1958_v43 = vcombine.low %v1519_v5, %v1523_v18  ;;  %v1901_v41 = vcombine.low %v2786_v24, %v2799_v1  ;;  %v1511_v54 = vsel %vm2573_vm13, %v1951_v2, %v1510_v57 }
 0x1d1   : > { %v1945_v32 = vcombine.low %v1412_v16, %v1426_v3  ;;  %v1515_v60 = vsel %vm2573_vm13, %v1952_v28, %v1514_v4  ;;  %807 = vst.msk [vmem:[#allocation3 + $0x8] sm:$0xff] %vm477_vm3, %v1900_v17  ;;  %v1599_v44 = vsel %vm1597_vm15, %v2112_v12, 0  ;;  %v1699_v47 = vsel %vm1597_vm15, %v1678_v8, 0 }
 0x1d2   : > { %808 = vst.msk [vmem:[#allocation3 + $0x10] sm:$0xff] %vm477_vm3, %v1901_v41  ;;  %v1957_v40 = vcombine.low %v1511_v54, %v1515_v60  ;;  %2019 = vmatpush3.bf16.msra.mxu1 %v1599_v44  ;;  %2029 = vmatpush3.bf16.msra.mxu0 %v1699_v47  ;;  %v2121_v47 = vld [vmem:[%s2400_s23 + $0x38] sm:$0xff] }
 0x1d3   : > { %1471 = vrot.lane.b32.xlu0 %v1945_v32, %s2232_s28  ;;  %1542 = vrot.lane.b32.xlu1 %v1958_v43, %s2229_s11 }
 0x1d7   : > { %1540 = vrot.lane.b32.xlu0 %v1957_v40, %s2229_s11 }
 0x1f5   : > { %v1065_v1 = vpop.permute.xlu1 %1064 }
 0x1f9   : > { %v1063_v52 = vpop.permute.xlu0 %1062 }
 0x1fa   : > { %v1329_v24 = vpop.permute.xlu1 %1328 }
 0x1fd   : > { %v1327_v31 = vpop.permute.xlu0 %1326 }
 0x1fe   : > { %v1069_v19 = vpop.permute.xlu1 %1068 }
 0x201   : > { %v1067_v37 = vpop.permute.xlu0 %1066 }
 0x202   : > { %v1333_v6 = vpop.permute.xlu1 %1332 }
 0x205   : > { %v3059_v7 = vpop.permute.xlu0 %1330 }
 0x206   : > { %v1010_v50 = vpop.permute.xlu1 %1009 }
 0x209   : > { %v1273_v23 = vpop.permute.xlu0 %1272 }
 0x20a   : > { %v1012_v36 = vpop.permute.xlu1 %1011 }
 0x20d   : > { %v1537_v62 = vpop.permute.xlu0 %1536 }
 0x20e   : > { %v1275_v30 = vpop.permute.xlu1 %1274 }
 0x211   : > { %v1539_v63 = vpop.permute.xlu0 %1538 }
 0x212   : > { %v1016_v14 = vpop.permute.xlu1 %1015 }
 0x215   : > { %v1014_v35 = vpop.permute.xlu0 %1013 }
 0x216   : > { %v1279_v58 = vpop.permute.xlu1 %1278 }
 0x219   : > { %v1277_v27 = vpop.permute.xlu0 %1276 }
 0x21a   : > { %v1206_v38 = vpop.permute.xlu1 %1205 }
 0x21d   : > { %v938_v9 = vpop.permute.xlu0 %937 }
 0x21e   : > { %950 = vst.msk [vmem:[#allocation3] sm:$0xff] %vm949_vm1, %v938_v9 }
 0x21f   : > { %1022 = vst.msk [vmem:[#allocation3] sm:$0xff] %vm1021_vm2, %v1010_v50  ;;  %v1470_v0 = vpop.permute.xlu1 %1469 }
 0x220   : > { %1075 = vst.msk [vmem:[#allocation3] sm:$0xff] %vm1074_vm4, %v1063_v52 }
 0x225   : > { %v940_v10 = vpop.permute.xlu0 %939 }
 0x226   : > { %951 = vst.msk [vmem:[#allocation3 + $0x8] sm:$0xff] %vm949_vm1, %v940_v10 }
 0x227   : > { %1023 = vst.msk [vmem:[#allocation3 + $0x8] sm:$0xff] %vm1021_vm2, %v1012_v36 }
 0x228   : > { %1076 = vst.msk [vmem:[#allocation3 + $0x8] sm:$0xff] %vm1074_vm4, %v1065_v1 }
 0x229   : > { %v942_v13 = vpop.permute.xlu1 %941  ;;  %1217 = vst.msk [vmem:[#allocation3 + $0x8] sm:$0xff] %vm1215_vm5, %v1206_v38  ;;  %v1204_v51 = vpop.permute.xlu0 %1203 }
 0x22a   : > { %952 = vst.msk [vmem:[#allocation3 + $0x10] sm:$0xff] %vm949_vm1, %v942_v13 }
 0x22b   : > { %1286 = vst.msk [vmem:[#allocation3 + $0x8] sm:$0xff] %vm1284_vm6, %v1275_v30 }
 0x22c   : > { %1216 = vst.msk [vmem:[#allocation3] sm:$0xff] %vm1215_vm5, %v1204_v51 }
 0x22d   : > { %1024 = vst.msk [vmem:[#allocation3 + $0x10] sm:$0xff] %vm1021_vm2, %v1014_v35 }
 0x22e   : > { %1285 = vst.msk [vmem:[#allocation3] sm:$0xff] %vm1284_vm6, %v1273_v23  ;;  %v2115_v23 = vld [vmem:[%s2400_s23 + $0x10] sm:$0xff] }
 0x22f   : > { %1340 = vst.msk [vmem:[#allocation3 + $0x8] sm:$0xff] %vm1338_vm7, %v1329_v24  ;;  %1339 = vst.msk [vmem:[#allocation3] sm:$0xff] %vm1338_vm7, %v1327_v31  ;;  %v1967_v31 = vld [vmem:[%s3202_s9] ss:$0 sm:$0xff] }
 0x230   : > { %1077 = vst.msk [vmem:[#allocation3 + $0x10] sm:$0xff] %vm1074_vm4, %v1067_v37 }
 0x231   : > { %1481 = vst.msk [vmem:[#allocation3 + $0x8] sm:$0xff] %vm1479_vm8, %v1470_v0  ;;  %v2118_v0 = vld [vmem:[%s2400_s23 + $0x8] sm:$0xff] }
 0x232   : > { %1550 = vst.msk [vmem:[#allocation3 + $0x8] sm:$0xff] %vm1548_vm9, %v1539_v63  ;;  %v2116_v63 = vld [vmem:[%s2400_s23] sm:$0xff] }
 0x233   : > { %v944_v25 = vpop.permute.xlu1 %943 }
 0x234   : > { %953 = vst.msk [vmem:[#allocation3 + $0x18] sm:$0xff] %vm949_vm1, %v944_v25  ;;  %v1468_v49 = vpop.permute.xlu0 %1467 }
 0x235   : > { %1025 = vst.msk [vmem:[#allocation3 + $0x18] sm:$0xff] %vm1021_vm2, %v1016_v14 }
 0x236   : > { %1480 = vst.msk [vmem:[#allocation3] sm:$0xff] %vm1479_vm8, %v1468_v49 }
 0x237   : > { %1078 = vst.msk [vmem:[#allocation3 + $0x18] sm:$0xff] %vm1074_vm4, %v1069_v19 }
 0x238   : > { %1549 = vst.msk [vmem:[#allocation3] sm:$0xff] %vm1548_vm9, %v1537_v62 }
 0x239   : > { %v1210_v53 = vpop.permute.xlu1 %1209  ;;  %v1554_v33 = vld [vmem:[#allocation3 + $0x8] sm:$0xff] }
 0x23a   : > { %1219 = vst.msk [vmem:[#allocation3 + $0x18] sm:$0xff] %vm1215_vm5, %v1210_v53 }
 0x23b   : > { %1288 = vst.msk [vmem:[#allocation3 + $0x18] sm:$0xff] %vm1284_vm6, %v1279_v58 }
 0x23c   : > { %1342 = vst.msk [vmem:[#allocation3 + $0x18] sm:$0xff] %vm1338_vm7, %v1333_v6 }
 0x23f   : > { %v1208_v34 = vpop.permute.xlu0 %1207  ;;  %v1553_v42 = vld [vmem:[#allocation3] sm:$0xff] }
 0x240   : > { %1218 = vst.msk [vmem:[#allocation3 + $0x10] sm:$0xff] %vm1215_vm5, %v1208_v34  ;;  %2020 = vmatprep.mubr.msk.bf16.mxu1 %vm1584_vm10, %v1553_v42 }
 0x241   : > { %v1474_v39 = vpop.permute.xlu1 %1473  ;;  %1287 = vst.msk [vmem:[#allocation3 + $0x10] sm:$0xff] %vm1284_vm6, %v1277_v27  ;;  %2021 = vmatmul.mubr.msk.bf16.vlgmr.msra.gmra.mrb[4].mxu1 %vm1584_vm10, %v1554_v33  ;;  %v2117_v27 = vld [vmem:[%s2400_s23 + $0x18] sm:$0xff] }
 0x242   : > { %1483 = vst.msk [vmem:[#allocation3 + $0x18] sm:$0xff] %vm1479_vm8, %v1474_v39  ;;  %v2119_v39 = vld [vmem:[%s2400_s23 + $0x30] sm:$0xff] }
 0x243   : > { %1341 = vst.msk [vmem:[#allocation3 + $0x10] sm:$0xff] %vm1338_vm7, %v3059_v7 }
 0x245   : > { %v1472_v59 = vpop.permute.xlu0 %1471  ;;  %v1543_v45 = vpop.permute.xlu1 %1542 }
 0x246   : > { %1482 = vst.msk [vmem:[#allocation3 + $0x10] sm:$0xff] %vm1479_vm8, %v1472_v59 }
 0x247   : > { %1552 = vst.msk [vmem:[#allocation3 + $0x18] sm:$0xff] %vm1548_vm9, %v1543_v45 }
 0x249   : > { %v1541_v11 = vpop.permute.xlu0 %1540 }
 0x24a   : > { %1551 = vst.msk [vmem:[#allocation3 + $0x10] sm:$0xff] %vm1548_vm9, %v1541_v11  ;;  %v2120_v11 = vld [vmem:[%s2400_s23 + $0x20] sm:$0xff] }
 0x24e   : > { %v1556_v61 = vld [vmem:[#allocation3 + $0x18] sm:$0xff] }
 0x251   : > { %v1555_v55 = vld [vmem:[#allocation3 + $0x10] sm:$0xff] }
 0x252   : > { %2024 = vmatprep.mubr.msk.bf16.mxu1 %vm1584_vm10, %v1555_v55 }
 0x253   : > { %2025 = vmatmul.mubr.msk.bf16.gmra.mrb[8].mxu1 %vm1584_vm10, %v1556_v61 }
 0x314   : > { %v2022_v26 = vpop.f32.mrb[4].mxu1 }
 0x315   : > { %v1644_v46 = vadd.f32 %v2022_v26, %v1959_v20  ;;  %v1635_v5 = vpop.f32.mrb[5].mxu1 }
 0x316   : > { %v1636_v21 = vadd.f32 %v1959_v20, %v1635_v5  ;;  %v2023_v29 = vpop.f32.mrb[6].mxu1 }
 0x317   : > { %v1647_v22 = vadd.f32 %v2023_v29, %v1959_v20  ;;  %v1638_v48 = vpop.f32.mrb[7].mxu1  ;;  %v1668_v16 = vmax.f32 %v1644_v46, 0.0  ;;  %v2122_v46 = vld [vmem:[%s2400_s23 + $0x28] sm:$0xff]  ;;  %s2153_s23 = scalar_lea.vmem %s3144_s30, 1024 }
 0x318   : > { %v1639_v18 = vadd.f32 %v1959_v20, %v1638_v48  ;;  %v1666_v2 = vmax.f32 %v1636_v21, 0.0  ;;  %p2154_p6 = scmp.ne.s32.totalorder %s3144_s30, %s2153_s23  ;;  %p2161_p10 = scmp.lt.s32.totalorder %s2159_s21, %s2153_s23 }
 0x319   : > { %v1669_v15 = vmax.f32 %v1647_v22, 0.0 }
 0x31a   : > { %v1667_v57 = vmax.f32 %v1639_v18, 0.0  ;;  %p2155_p12 = pnand %p2154_p6, %p3276_p11  ;;  %p2162_p0 = por %p2161_p10, %p2160_p8 }
 0x31b   : > { %v1675_v28 = vpack.c.bf16 %v1669_v15, %v1668_v16 }
 0x31c   : > { %v1674_v4 = vpack.c.bf16 %v1667_v57, %v1666_v2  ;;  %p2156_p13 = pneg %p2155_p12 }
 0x31e   : > { %2030 = vmatprep.mubr.msk.bf16.mxu0 %vm477_vm3, %v1674_v4  ;;  %p2163_p2 = pnand %p2162_p0, %p2156_p13 }
 0x31f   : > { %2031 = vmatmul.mubr.msk.bf16.vlgmr.msra.gmra.mrb[4].mxu0 %vm477_vm3, %v1675_v28 }
 0x326   : > { %v2026_v3 = vpop.f32.mrb[8].mxu1 }
 0x327   : > { %v1660_v17 = vadd.f32 %v2026_v3, %v1959_v20  ;;  %v1651_v12 = vpop.f32.mrb[9].mxu1 }
 0x328   : > { %v1652_v32 = vadd.f32 %v1959_v20, %v1651_v12  ;;  %v2027_v43 = vpop.f32.mrb[10].mxu1 }
 0x329   : > { %v1663_v41 = vadd.f32 %v2027_v43, %v1959_v20  ;;  %v1654_v54 = vpop.f32.mrb[11].mxu1  ;;  %v1672_v56 = vmax.f32 %v1660_v17, 0.0 }
 0x32a   : > { %v1655_v60 = vadd.f32 %v1959_v20, %v1654_v54  ;;  %v1670_v40 = vmax.f32 %v1652_v32, 0.0 }
 0x32b   : > { %v1673_v44 = vmax.f32 %v1663_v41, 0.0 }
 0x32c   : > { %v1671_v1 = vmax.f32 %v1655_v60, 0.0 }
 0x32d   : > { %v1677_v52 = vpack.c.bf16 %v1673_v44, %v1672_v56 }
 0x32e   : > { %v1676_v24 = vpack.c.bf16 %v1671_v1, %v1670_v40 }
 0x330   : > { %2034 = vmatprep.mubr.msk.bf16.mxu0 %vm477_vm3, %v1676_v24 }
 0x331   : > { %2035 = vmatmul.mubr.msk.bf16.gmra.mrb[8].mxu0 %vm477_vm3, %v1677_v52 }
 0x3f2   : > { %v2032_v19 = vpop.f32.mrb[4].mxu0 }
 0x3f3   : > { %v1744_v37 = vadd.f32 %v2032_v19, %v1967_v31  ;;  %v1735_v6 = vpop.f32.mrb[5].mxu0 }
 0x3f4   : > { %v1736_v7 = vadd.f32 %v1967_v31, %v1735_v6  ;;  %v2033_v50 = vpop.f32.mrb[6].mxu0 }
 0x3f5   : > { %v1768_v36 = vadd.f32 %v2115_v23, %v1744_v37  ;;  %v1747_v62 = vadd.f32 %v2033_v50, %v1967_v31  ;;  %v1738_v30 = vpop.f32.mrb[7].mxu0 }
 0x3f6   : > { %v1766_v14 = vadd.f32 %v2116_v63, %v1736_v7  ;;  %v1739_v35 = vadd.f32 %v1967_v31, %v1738_v30 }
 0x3f7   : > { %v1776_v58 = vmax.f32 %v1768_v36, 0.0  ;;  %v1769_v38 = vadd.f32 %v2117_v27, %v1747_v62 }
 0x3f8   : > { %v1774_v9 = vmax.f32 %v1766_v14, 0.0  ;;  %v1767_v10 = vadd.f32 %v2118_v0, %v1739_v35 }
 0x3f9   : > { %1784 = vst.msk [vmem:[%s3119_s29 + $0x10] sm:$0xff] %vm399_vm0, %v1776_v58  ;;  %v1777_v13 = vmax.f32 %v1769_v38, 0.0 }
 0x3fa   : > { %1782 = vst.msk [vmem:[%s3119_s29] sm:$0xff] %vm399_vm0, %v1774_v9  ;;  %v1775_v51 = vmax.f32 %v1767_v10, 0.0 }
 0x3fb   : > { %1785 = vst.msk [vmem:[%s3119_s29 + $0x18] sm:$0xff] %vm399_vm0, %v1777_v13 }
 0x3fc   : > { %1783 = vst.msk [vmem:[%s3119_s29 + $0x8] sm:$0xff] %vm399_vm0, %v1775_v51 }
 0x404   : > { %v2036_v25 = vpop.f32.mrb[8].mxu0 }
 0x405   : > { %v1760_v49 = vadd.f32 %v2036_v25, %v1967_v31  ;;  %v1751_v53 = vpop.f32.mrb[9].mxu0 }
 0x406   : > { %v1752_v34 = vadd.f32 %v1967_v31, %v1751_v53  ;;  %v2037_v42 = vpop.f32.mrb[10].mxu0 }
 0x407   : > { %v1772_v33 = vadd.f32 %v2119_v39, %v1760_v49  ;;  %v1763_v59 = vadd.f32 %v2037_v42, %v1967_v31  ;;  %v1754_v45 = vpop.f32.mrb[11].mxu0 }
 0x408   : > { %v1770_v61 = vadd.f32 %v2120_v11, %v1752_v34  ;;  %v1755_v55 = vadd.f32 %v1967_v31, %v1754_v45 }
 0x409   : > { %v1780_v8 = vmax.f32 %v1772_v33, 0.0  ;;  %v1773_v20 = vadd.f32 %v2121_v47, %v1763_v59 }
 0x40a   : > { %v1778_v26 = vmax.f32 %v1770_v61, 0.0  ;;  %v1771_v5 = vadd.f32 %v2122_v46, %v1755_v55 }
 0x40b   : > { %1788 = vst.msk [vmem:[%s3119_s29 + $0x30] sm:$0xff] %vm399_vm0, %v1780_v8  ;;  %v1781_v21 = vmax.f32 %v1773_v20, 0.0 }
 0x40c   : > { %1786 = vst.msk [vmem:[%s3119_s29 + $0x20] sm:$0xff] %vm399_vm0, %v1778_v26  ;;  %v1779_v29 = vmax.f32 %v1771_v5, 0.0 }
 0x40d   : > { %1789 = vst.msk [vmem:[%s3119_s29 + $0x38] sm:$0xff] %vm399_vm0, %v1781_v21 }
 0x40e   : > { %1787 = vst.msk [vmem:[%s3119_s29 + $0x28] sm:$0xff] %vm399_vm0, %v1779_v29 }
 0x40f   : > { %2166 = shalt.err (!%p2163_p2)
}
 0x410   : > { %s2167_s29 = scalar_lea.hbm %s3140_s22, 1024  ;;  %s2171_s28 = scalar_lea.hbm %s3203_s10, 2048 }
 0x411   : > { %p2168_p4 = scmp.ne.s32.totalorder %s3140_s22, %s2167_s29  ;;  %p2172_p9 = scmp.lt.u32.totalorder %s3140_s22, %s3203_s10 }
 0x412   : > { %p2173_p1 = scmp.lt.u32.totalorder %s2171_s28, %s2167_s29  ;;  %p2175_p6 = scmp.lt.u32.totalorder %s2167_s29, %s3140_s22 }
 0x413   : > { %p2169_p5 = pnand %p2168_p4, %p3276_p11 }
 0x414   : > { %p2174_p3 = por %p2173_p1, %p2172_p9 }
 0x415   : > { %p2170_p7 = pneg %p2169_p5 }
 0x416   : > { %p2176_p12 = por %p2175_p6, %p2174_p3 }
 0x418   : > { %p2177_p13 = pnand %p2176_p12, %p2170_p7 }
 0x41a   : > { %2180 = shalt.err (!%p2177_p13)
}
 0x41b   : > { %s2234_s23 = smov 128  }
 0x41c   : > { %2044 = dma.vmem_to_hbm [thread:$0]  (%p3276_p11), %s3144_s30, 1024, %s3140_s22, %s1791_s17, %s2234_s23, %s2234_s23, %s2227_s20  }
 0x41d PF: > { %s1819_s21 = sand.u32 1, %s2207_s13   ;;  %p3277_p8 = scmp.ne.s32.totalorder %s3220_s26, 0 }
 0x41e   : > { %p3278_p10 = scmp.ge.s32.totalorder %s2219_s16, 2  ;;  %s1820_s29 = scalar_lea.sflag [#allocation6], %s1819_s21 }
 0x420   : > { %p2051_p0 = pnand %p3278_p10, %p3277_p8 }
 0x422   : > { %2202 = dma.done.wait (!%p2051_p0), %s1820_s29, 1024  }
 0x423   : > { %2204 = vsyncadd (!%p2051_p0), %s1820_s29, 4294966272  ;;  %s3279_s25 = sld [smem:[#allocation10_spill]]  ;;  %p23_p2 = scmp.ge.s32.totalorder %s2315_s19, 4  }
 0x424   : > { %s3280_s13 = smov %s2211_s14  ;;  %s3281_s14 = smov %s2215_s15 }
 0x425   : > { %s3283_s16 = smov %s2315_s19  ;;  %25 = sbr.rel (!%p23_p2) target bundleno = 5 (0x5), region = 107 }
 0x429   : > { %s3282_s15 = smov %s3279_s25 }
 0x42c   :  { %1825 = vsyncpa [#allocation5], 1 }
 0x42d   :  { %1827 = vsyncpa [#allocation5 + $0x1], 1 }
 0x42e   :  { %1828 = vsyncpa [#allocation6], 1 }
 0x42f   :  { %1830 = vsyncpa [#allocation6 + $0x1], 1 }

</bundles_post_ra>
